<compile_context>
chip_gen: v5e
topology: v5e:2x2
jax: 0.10.0
libtpu: 0.0.40
codegen_flags: <defaults>
</compile_context>

<pallas_src>
import jax
import jax.numpy as jnp
from jax.experimental import pallas as pl
from jax.experimental.pallas import tpu as pltpu  # noqa: F401  (TPU backend)

# ---- "config" / "word_sequence" constants (synthetic, deterministic) -------------
VOCAB = 16          # len(word_sequence)
EMB = 32            # config.de_embedding_dim
HID = 32            # config.de_hidden_size (== EMB so GRU layers stack uniformly)
LAYERS = 2          # config.de_num_layers
BATCH = 8           # config.batch_size
T_LEN = 8           # config.output_std_len
SOS = 1             # word_sequence.SOS


def _gru_decoder_kernel(x_ref, h0_ref, wih0_ref, bih0_ref, whh0_ref, bhh0_ref,
                        wcat_ref, bcat_ref, wfc_ref, bfc_ref,
                        out_ref, hout_ref):
    """Whole teacher-forced decode (all T_LEN steps) in one kernel invocation.

    x_ref   : [T*B, E]       embedded step inputs, time-major flattened
    h0_ref  : [L, B, H]      encoder hidden
    wih0_ref: [E, 3H]        layer-0 GRU input weight, pre-transposed (r|z|n columns)
    bih0_ref: [1, 3H]
    whh0_ref: [H, 3H]        layer-0 GRU hidden weight, pre-transposed
    bhh0_ref: [1, 3H]
    wcat_ref: [L-1, 2H, 4H]  fused layer>=1 weights (block layout, see wrapper)
    bcat_ref: [L-1, 1, 4H]
    wfc_ref : [H, V]         fc weight, pre-transposed
    bfc_ref : [1, V]
    out_ref : [B, T*V]       lane-dense log-softmax outputs (reshape -> [B, T, V])
    hout_ref: [L, B, H]      final hidden state
    """
    # Hoisted layer-0 input projection over all T steps: one MXU matmul.
    gi0_all = jnp.dot(x_ref[...], wih0_ref[...],
                      preferred_element_type=jnp.float32) + bih0_ref[...]     # [T*B, 3H]

    # Hoist weight/bias loads out of the unrolled time loop.
    whh0 = whh0_ref[...]
    bhh0 = bhh0_ref[...]
    wcat = [wcat_ref[l] for l in range(LAYERS - 1)]
    bcat = [bcat_ref[l] for l in range(LAYERS - 1)]
    wfc = wfc_ref[...]
    bfc = bfc_ref[...]

    hs = [h0_ref[l] for l in range(LAYERS)]   # per-layer hidden state, carried in vregs
    outs = []
    for t in range(T_LEN):                    # static unroll over time
        # ---- layer 0: input projection already done; only h @ W_hh per step ----
        gi = gi0_all[t * BATCH:(t + 1) * BATCH, :]                            # [B, 3H]
        gh = jnp.dot(hs[0], whh0, preferred_element_type=jnp.float32) + bhh0  # [B, 3H]
        r = jax.nn.sigmoid(gi[:, :HID] + gh[:, :HID])
        z = jax.nn.sigmoid(gi[:, HID:2 * HID] + gh[:, HID:2 * HID])
        n = jnp.tanh(gi[:, 2 * HID:] + r * gh[:, 2 * HID:])
        hs[0] = (1.0 - z) * n + z * hs[0]
        x = hs[0]

        # ---- layers >= 1: single fused matmul per layer per step ----
        # g = [x|h] @ Wcat + bcat = [gi_r+gh_r | gi_z+gh_z | gi_n | gh_n]  (4H = 128 lanes)
        for l in range(1, LAYERS):
            xh = jnp.concatenate([x, hs[l]], axis=1)                          # [B, 2H]
            g = jnp.dot(xh, wcat[l - 1],
                        preferred_element_type=jnp.float32) + bcat[l - 1]     # [B, 4H]
            r = jax.nn.sigmoid(g[:, :HID])
            z = jax.nn.sigmoid(g[:, HID:2 * HID])
            n = jnp.tanh(g[:, 2 * HID:3 * HID] + r * g[:, 3 * HID:])
            hs[l] = (1.0 - z) * n + z * hs[l]
            x = hs[l]

        # ---- fc + log_softmax on the top layer's output ----
        logits = jnp.dot(x, wfc, preferred_element_type=jnp.float32) + bfc    # [B, V]
        m = jnp.max(logits, axis=-1, keepdims=True)
        s = logits - m
        lse = jnp.log(jnp.sum(jnp.exp(s), axis=-1, keepdims=True))
        outs.append(s - lse)

    # One dense 128-lane store: [B, T*V] = [8, 128].
    out_ref[...] = jnp.concatenate(outs, axis=1)
    for l in range(LAYERS):
        hout_ref[l] = hs[l]


def num_decoder_forward(params, encoder_hidden, target):
    """Pallas equivalent of NumDecoder.forward (teacher forcing always on).

    encoder_hidden: [LAYERS, BATCH, HID] f32
    target        : [BATCH, T_LEN] int32
    returns (decoder_outputs [B, T, V], decoder_hidden [L, B, H])
    """
    # Embedding gather (plain-JAX glue): step-t token = SOS if t==0 else target[:, t-1].
    sos = jnp.full((BATCH, 1), SOS, dtype=jnp.int32)
    tokens = jnp.concatenate([sos, target[:, :-1]], axis=1)                 # [B, T]
    emb = jnp.take(params["embedding"], tokens, axis=0)                     # [B, T, E]
    x_flat = jnp.transpose(emb, (1, 0, 2)).reshape(T_LEN * BATCH, EMB)
    x_flat = x_flat.astype(jnp.float32)                                     # [T*B, E]

    # ---- pre-transposed / pre-fused weights (once per call, plain JAX) ----
    wih0_t = params["w_ih"][0].T                                            # [E, 3H]
    bih0 = params["b_ih"][0][None, :]                                       # [1, 3H]
    whh0_t = params["w_hh"][0].T                                            # [H, 3H]
    bhh0 = params["b_hh"][0][None, :]                                       # [1, 3H]

    # Fused block-structured weights for layers >= 1 (PyTorch gate order r|z|n):
    #   cols [0:2H]   <- stacked W_ih/W_hh r,z columns  -> gives gi_{r,z}+gh_{r,z}
    #   cols [2H:3H]  <- W_ih n columns only            -> gives gi_n
    #   cols [3H:4H]  <- W_hh n columns only            -> gives gh_n
    wcats, bcats = [], []
    for l in range(1, LAYERS):
        wih_t = params["w_ih"][l].T                                         # [H, 3H]
        whh_t = params["w_hh"][l].T                                         # [H, 3H]
        wc = jnp.zeros((2 * HID, 4 * HID), jnp.float32)
        wc = wc.at[:HID, :2 * HID].set(wih_t[:, :2 * HID])
        wc = wc.at[HID:, :2 * HID].set(whh_t[:, :2 * HID])
        wc = wc.at[:HID, 2 * HID:3 * HID].set(wih_t[:, 2 * HID:])
        wc = wc.at[HID:, 3 * HID:].set(whh_t[:, 2 * HID:])
        bi, bh = params["b_ih"][l], params["b_hh"][l]
        bc = jnp.concatenate([bi[:2 * HID] + bh[:2 * HID], bi[2 * HID:], bh[2 * HID:]])
        wcats.append(wc)
        bcats.append(bc[None, :])
    w_cat = jnp.stack(wcats)                                                # [L-1, 2H, 4H]
    b_cat = jnp.stack(bcats)                                                # [L-1, 1, 4H]

    wfc_t = params["w_fc"].T                                                # [H, V]
    bfc = params["b_fc"]                                                    # [1, V]

    # Single invocation (grid = ()); every operand lives whole in VMEM (~60 KB total).
    out_flat, hidden = pl.pallas_call(
        _gru_decoder_kernel,
        out_shape=(
            jax.ShapeDtypeStruct((BATCH, T_LEN * VOCAB), jnp.float32),      # lane-dense [8,128]
            jax.ShapeDtypeStruct((LAYERS, BATCH, HID), jnp.float32),
        ),
    )(x_flat, encoder_hidden, wih0_t, bih0, whh0_t, bhh0, w_cat, b_cat, wfc_t, bfc)

    decoder_outputs = out_flat.reshape(BATCH, T_LEN, VOCAB)                 # [B, T, V]
    return decoder_outputs, hidden


# ---- pure-JAX reference for correctness -------------------------------------------
def reference_forward(params, encoder_hidden, target):
    sos = jnp.full((BATCH, 1), SOS, dtype=jnp.int32)
    tokens = jnp.concatenate([sos, target[:, :-1]], axis=1)
    emb = jnp.take(params["embedding"], tokens, axis=0)
    h = encoder_hidden
    outs = []
    for t in range(T_LEN):
        x = emb[:, t, :]
        new_h = []
        for layer in range(LAYERS):
            hl = h[layer]
            gi = x @ params["w_ih"][layer].T + params["b_ih"][layer]
            gh = hl @ params["w_hh"][layer].T + params["b_hh"][layer]
            r = jax.nn.sigmoid(gi[:, :HID] + gh[:, :HID])
            z = jax.nn.sigmoid(gi[:, HID:2 * HID] + gh[:, HID:2 * HID])
            n = jnp.tanh(gi[:, 2 * HID:] + r * gh[:, 2 * HID:])
            hn = (1.0 - z) * n + z * hl
            new_h.append(hn)
            x = hn
        h = jnp.stack(new_h)
        logits = x @ params["w_fc"].T + params["b_fc"][0]
        outs.append(jax.nn.log_softmax(logits, axis=-1))
    return jnp.stack(outs, axis=1), h


def init_params(key):
    ks = jax.random.split(key, 8)
    scale = 0.1
    return {
        "embedding": (jax.random.normal(ks[0], (VOCAB, EMB)) * scale).astype(jnp.float32),
        "w_ih": (jax.random.normal(ks[1], (LAYERS, 3 * HID, EMB)) * scale).astype(jnp.float32),
        "w_hh": (jax.random.normal(ks[2], (LAYERS, 3 * HID, HID)) * scale).astype(jnp.float32),
        "b_ih": (jax.random.normal(ks[3], (LAYERS, 3 * HID)) * scale).astype(jnp.float32),
        "b_hh": (jax.random.normal(ks[4], (LAYERS, 3 * HID)) * scale).astype(jnp.float32),
        "w_fc": (jax.random.normal(ks[5], (VOCAB, HID)) * scale).astype(jnp.float32),
        "b_fc": (jax.random.normal(ks[6], (1, VOCAB)) * scale).astype(jnp.float32),
    }


if __name__ == "__main__":
    key = jax.random.PRNGKey(0)
    k_params, k_hidden, k_target = jax.random.split(key, 3)

    params = init_params(k_params)
    encoder_hidden = (jax.random.normal(k_hidden, (LAYERS, BATCH, HID)) * 0.5).astype(jnp.float32)
    target = jax.random.randint(k_target, (BATCH, T_LEN), 0, VOCAB, dtype=jnp.int32)

    outputs, hidden = jax.block_until_ready(
        num_decoder_forward(params, encoder_hidden, target))

    ref_outputs, ref_hidden = reference_forward(params, encoder_hidden, target)

    assert outputs.shape == (BATCH, T_LEN, VOCAB)
    assert hidden.shape == (LAYERS, BATCH, HID)
    assert jnp.allclose(outputs, ref_outputs, atol=2e-3, rtol=2e-3)
    assert jnp.allclose(hidden, ref_hidden, atol=2e-3, rtol=2e-3)

    print("KERNEL_OK")
</pallas_src>

<mosaic_0001>
module attributes {stable_mosaic.version = 11 : i64} {
  func.func @_gru_decoder_kernel(%arg0: memref<64x32xf32, #tpu.memory_space<vmem>>, %arg1: memref<2x8x32xf32, #tpu.memory_space<vmem>>, %arg2: memref<32x96xf32, #tpu.memory_space<vmem>>, %arg3: memref<1x96xf32, #tpu.memory_space<vmem>>, %arg4: memref<32x96xf32, #tpu.memory_space<vmem>>, %arg5: memref<1x96xf32, #tpu.memory_space<vmem>>, %arg6: memref<1x64x128xf32, #tpu.memory_space<vmem>>, %arg7: memref<1x1x128xf32, #tpu.memory_space<vmem>>, %arg8: memref<32x16xf32, #tpu.memory_space<vmem>>, %arg9: memref<1x16xf32, #tpu.memory_space<vmem>>, %arg10: memref<8x128xf32, #tpu.memory_space<vmem>>, %arg11: memref<2x8x32xf32, #tpu.memory_space<vmem>>) attributes {dimension_semantics = [], scalar_prefetch = 0 : i64, scratch_operands = 0 : i64, tpu.core_type = #tpu.core_type<tc>} {
    %c0 = arith.constant 0 : index
    %c0_0 = arith.constant 0 : index
    %0 = vector.load %arg0[%c0, %c0_0] : memref<64x32xf32, #tpu.memory_space<vmem>>, vector<64x32xf32>
    %c0_1 = arith.constant 0 : index
    %c0_2 = arith.constant 0 : index
    %1 = vector.load %arg2[%c0_1, %c0_2] : memref<32x96xf32, #tpu.memory_space<vmem>>, vector<32x96xf32>
    %cst = arith.constant dense<0.000000e+00> : vector<64x96xf32>
    %2 = tpu.matmul %0, %1, %cst {dimension_numbers = #tpu.dot_dimension_numbers<[1], [0], [0], [1], [0, 0, 1, 1], [], []>} : vector<64x32xf32>, vector<32x96xf32>, vector<64x96xf32> -> vector<64x96xf32>
    %c0_3 = arith.constant 0 : index
    %c0_4 = arith.constant 0 : index
    %3 = vector.load %arg3[%c0_3, %c0_4] : memref<1x96xf32, #tpu.memory_space<vmem>>, vector<1x96xf32>
    %4 = vector.broadcast %3 : vector<1x96xf32> to vector<64x96xf32>
    %5 = arith.addf %2, %4 : vector<64x96xf32>
    %c0_5 = arith.constant 0 : index
    %c0_6 = arith.constant 0 : index
    %6 = vector.load %arg4[%c0_5, %c0_6] : memref<32x96xf32, #tpu.memory_space<vmem>>, vector<32x96xf32>
    %c0_7 = arith.constant 0 : index
    %c0_8 = arith.constant 0 : index
    %7 = vector.load %arg5[%c0_7, %c0_8] : memref<1x96xf32, #tpu.memory_space<vmem>>, vector<1x96xf32>
    %c0_9 = arith.constant 0 : index
    %c0_10 = arith.constant 0 : index
    %c0_11 = arith.constant 0 : index
    %8 = vector.load %arg6[%c0_9, %c0_10, %c0_11] : memref<1x64x128xf32, #tpu.memory_space<vmem>>, vector<1x64x128xf32>
    %9 = vector.shape_cast %8 : vector<1x64x128xf32> to vector<64x128xf32>
    %c0_12 = arith.constant 0 : index
    %c0_13 = arith.constant 0 : index
    %c0_14 = arith.constant 0 : index
    %10 = vector.load %arg7[%c0_12, %c0_13, %c0_14] : memref<1x1x128xf32, #tpu.memory_space<vmem>>, vector<1x1x128xf32>
    %11 = vector.shape_cast %10 : vector<1x1x128xf32> to vector<1x128xf32>
    %c0_15 = arith.constant 0 : index
    %c0_16 = arith.constant 0 : index
    %12 = vector.load %arg8[%c0_15, %c0_16] : memref<32x16xf32, #tpu.memory_space<vmem>>, vector<32x16xf32>
    %c0_17 = arith.constant 0 : index
    %c0_18 = arith.constant 0 : index
    %13 = vector.load %arg9[%c0_17, %c0_18] : memref<1x16xf32, #tpu.memory_space<vmem>>, vector<1x16xf32>
    %c0_19 = arith.constant 0 : index
    %c0_20 = arith.constant 0 : index
    %c0_21 = arith.constant 0 : index
    %14 = vector.load %arg1[%c0_19, %c0_20, %c0_21] : memref<2x8x32xf32, #tpu.memory_space<vmem>>, vector<1x8x32xf32>
    %15 = vector.shape_cast %14 : vector<1x8x32xf32> to vector<8x32xf32>
    %c1 = arith.constant 1 : index
    %c0_22 = arith.constant 0 : index
    %c0_23 = arith.constant 0 : index
    %16 = vector.load %arg1[%c1, %c0_22, %c0_23] : memref<2x8x32xf32, #tpu.memory_space<vmem>>, vector<1x8x32xf32>
    %17 = vector.shape_cast %16 : vector<1x8x32xf32> to vector<8x32xf32>
    %18 = vector.extract_strided_slice %5 {offsets = [0, 0], sizes = [8, 96], strides = [1, 1]} : vector<64x96xf32> to vector<8x96xf32>
    %cst_24 = arith.constant dense<0.000000e+00> : vector<8x96xf32>
    %19 = tpu.matmul %15, %6, %cst_24 {dimension_numbers = #tpu.dot_dimension_numbers<[1], [0], [0], [1], [0, 0, 1, 1], [], []>} : vector<8x32xf32>, vector<32x96xf32>, vector<8x96xf32> -> vector<8x96xf32>
    %20 = vector.broadcast %7 : vector<1x96xf32> to vector<8x96xf32>
    %21 = arith.addf %19, %20 : vector<8x96xf32>
    %22 = vector.extract_strided_slice %18 {offsets = [0, 0], sizes = [8, 32], strides = [1, 1]} : vector<8x96xf32> to vector<8x32xf32>
    %23 = vector.extract_strided_slice %21 {offsets = [0, 0], sizes = [8, 32], strides = [1, 1]} : vector<8x96xf32> to vector<8x32xf32>
    %24 = arith.addf %22, %23 : vector<8x32xf32>
    %25 = arith.negf %24 : vector<8x32xf32>
    %26 = math.exp %25 : vector<8x32xf32>
    %cst_25 = arith.constant 1.000000e+00 : f32
    %27 = vector.broadcast %cst_25 : f32 to vector<8x32xf32>
    %28 = arith.addf %27, %26 : vector<8x32xf32>
    %29 = arith.divf %27, %28 : vector<8x32xf32>
    %30 = vector.extract_strided_slice %18 {offsets = [0, 32], sizes = [8, 32], strides = [1, 1]} : vector<8x96xf32> to vector<8x32xf32>
    %31 = vector.extract_strided_slice %21 {offsets = [0, 32], sizes = [8, 32], strides = [1, 1]} : vector<8x96xf32> to vector<8x32xf32>
    %32 = arith.addf %30, %31 : vector<8x32xf32>
    %33 = arith.negf %32 : vector<8x32xf32>
    %34 = math.exp %33 : vector<8x32xf32>
    %cst_26 = arith.constant 1.000000e+00 : f32
    %35 = vector.broadcast %cst_26 : f32 to vector<8x32xf32>
    %36 = arith.addf %35, %34 : vector<8x32xf32>
    %37 = arith.divf %35, %36 : vector<8x32xf32>
    %38 = vector.extract_strided_slice %18 {offsets = [0, 64], sizes = [8, 32], strides = [1, 1]} : vector<8x96xf32> to vector<8x32xf32>
    %39 = vector.extract_strided_slice %21 {offsets = [0, 64], sizes = [8, 32], strides = [1, 1]} : vector<8x96xf32> to vector<8x32xf32>
    %40 = arith.mulf %29, %39 : vector<8x32xf32>
    %41 = arith.addf %38, %40 : vector<8x32xf32>
    %42 = math.tanh %41 : vector<8x32xf32>
    %cst_27 = arith.constant 1.000000e+00 : f32
    %43 = vector.broadcast %cst_27 : f32 to vector<8x32xf32>
    %44 = arith.subf %43, %37 : vector<8x32xf32>
    %45 = arith.mulf %44, %42 : vector<8x32xf32>
    %46 = arith.mulf %37, %15 : vector<8x32xf32>
    %47 = arith.addf %45, %46 : vector<8x32xf32>
    %48 = tpu.concatenate %47, %17 in 1 : vector<8x32xf32>, vector<8x32xf32> -> vector<8x64xf32>
    %cst_28 = arith.constant dense<0.000000e+00> : vector<8x128xf32>
    %49 = tpu.matmul %48, %9, %cst_28 {dimension_numbers = #tpu.dot_dimension_numbers<[1], [0], [0], [1], [0, 0, 1, 1], [], []>} : vector<8x64xf32>, vector<64x128xf32>, vector<8x128xf32> -> vector<8x128xf32>
    %50 = vector.broadcast %11 : vector<1x128xf32> to vector<8x128xf32>
    %51 = arith.addf %49, %50 : vector<8x128xf32>
    %52 = vector.extract_strided_slice %51 {offsets = [0, 0], sizes = [8, 32], strides = [1, 1]} : vector<8x128xf32> to vector<8x32xf32>
    %53 = arith.negf %52 : vector<8x32xf32>
    %54 = math.exp %53 : vector<8x32xf32>
    %cst_29 = arith.constant 1.000000e+00 : f32
    %55 = vector.broadcast %cst_29 : f32 to vector<8x32xf32>
    %56 = arith.addf %55, %54 : vector<8x32xf32>
    %57 = arith.divf %55, %56 : vector<8x32xf32>
    %58 = vector.extract_strided_slice %51 {offsets = [0, 32], sizes = [8, 32], strides = [1, 1]} : vector<8x128xf32> to vector<8x32xf32>
    %59 = arith.negf %58 : vector<8x32xf32>
    %60 = math.exp %59 : vector<8x32xf32>
    %cst_30 = arith.constant 1.000000e+00 : f32
    %61 = vector.broadcast %cst_30 : f32 to vector<8x32xf32>
    %62 = arith.addf %61, %60 : vector<8x32xf32>
    %63 = arith.divf %61, %62 : vector<8x32xf32>
    %64 = vector.extract_strided_slice %51 {offsets = [0, 64], sizes = [8, 32], strides = [1, 1]} : vector<8x128xf32> to vector<8x32xf32>
    %65 = vector.extract_strided_slice %51 {offsets = [0, 96], sizes = [8, 32], strides = [1, 1]} : vector<8x128xf32> to vector<8x32xf32>
    %66 = arith.mulf %57, %65 : vector<8x32xf32>
    %67 = arith.addf %64, %66 : vector<8x32xf32>
    %68 = math.tanh %67 : vector<8x32xf32>
    %cst_31 = arith.constant 1.000000e+00 : f32
    %69 = vector.broadcast %cst_31 : f32 to vector<8x32xf32>
    %70 = arith.subf %69, %63 : vector<8x32xf32>
    %71 = arith.mulf %70, %68 : vector<8x32xf32>
    %72 = arith.mulf %63, %17 : vector<8x32xf32>
    %73 = arith.addf %71, %72 : vector<8x32xf32>
    %cst_32 = arith.constant dense<0.000000e+00> : vector<8x16xf32>
    %74 = tpu.matmul %73, %12, %cst_32 {dimension_numbers = #tpu.dot_dimension_numbers<[1], [0], [0], [1], [0, 0, 1, 1], [], []>} : vector<8x32xf32>, vector<32x16xf32>, vector<8x16xf32> -> vector<8x16xf32>
    %75 = vector.broadcast %13 : vector<1x16xf32> to vector<8x16xf32>
    %76 = arith.addf %74, %75 : vector<8x16xf32>
    %cst_33 = arith.constant dense<0xFF800000> : vector<8xf32>
    %77 = vector.multi_reduction <maximumf>, %76, %cst_33 [1] : vector<8x16xf32> to vector<8xf32>
    %78 = vector.shape_cast %77 : vector<8xf32> to vector<8x1xf32>
    %79 = vector.broadcast %78 : vector<8x1xf32> to vector<8x16xf32>
    %80 = arith.subf %76, %79 : vector<8x16xf32>
    %81 = math.exp %80 : vector<8x16xf32>
    %cst_34 = arith.constant dense<0.000000e+00> : vector<8xf32>
    %82 = vector.multi_reduction <add>, %81, %cst_34 [1] : vector<8x16xf32> to vector<8xf32>
    %83 = vector.shape_cast %82 : vector<8xf32> to vector<8x1xf32>
    %84 = math.log %83 : vector<8x1xf32>
    %85 = vector.broadcast %84 : vector<8x1xf32> to vector<8x16xf32>
    %86 = arith.subf %80, %85 : vector<8x16xf32>
    %87 = vector.extract_strided_slice %5 {offsets = [8, 0], sizes = [8, 96], strides = [1, 1]} : vector<64x96xf32> to vector<8x96xf32>
    %cst_35 = arith.constant dense<0.000000e+00> : vector<8x96xf32>
    %88 = tpu.matmul %47, %6, %cst_35 {dimension_numbers = #tpu.dot_dimension_numbers<[1], [0], [0], [1], [0, 0, 1, 1], [], []>} : vector<8x32xf32>, vector<32x96xf32>, vector<8x96xf32> -> vector<8x96xf32>
    %89 = vector.broadcast %7 : vector<1x96xf32> to vector<8x96xf32>
    %90 = arith.addf %88, %89 : vector<8x96xf32>
    %91 = vector.extract_strided_slice %87 {offsets = [0, 0], sizes = [8, 32], strides = [1, 1]} : vector<8x96xf32> to vector<8x32xf32>
    %92 = vector.extract_strided_slice %90 {offsets = [0, 0], sizes = [8, 32], strides = [1, 1]} : vector<8x96xf32> to vector<8x32xf32>
    %93 = arith.addf %91, %92 : vector<8x32xf32>
    %94 = arith.negf %93 : vector<8x32xf32>
    %95 = math.exp %94 : vector<8x32xf32>
    %cst_36 = arith.constant 1.000000e+00 : f32
    %96 = vector.broadcast %cst_36 : f32 to vector<8x32xf32>
    %97 = arith.addf %96, %95 : vector<8x32xf32>
    %98 = arith.divf %96, %97 : vector<8x32xf32>
    %99 = vector.extract_strided_slice %87 {offsets = [0, 32], sizes = [8, 32], strides = [1, 1]} : vector<8x96xf32> to vector<8x32xf32>
    %100 = vector.extract_strided_slice %90 {offsets = [0, 32], sizes = [8, 32], strides = [1, 1]} : vector<8x96xf32> to vector<8x32xf32>
    %101 = arith.addf %99, %100 : vector<8x32xf32>
    %102 = arith.negf %101 : vector<8x32xf32>
    %103 = math.exp %102 : vector<8x32xf32>
    %cst_37 = arith.constant 1.000000e+00 : f32
    %104 = vector.broadcast %cst_37 : f32 to vector<8x32xf32>
    %105 = arith.addf %104, %103 : vector<8x32xf32>
    %106 = arith.divf %104, %105 : vector<8x32xf32>
    %107 = vector.extract_strided_slice %87 {offsets = [0, 64], sizes = [8, 32], strides = [1, 1]} : vector<8x96xf32> to vector<8x32xf32>
    %108 = vector.extract_strided_slice %90 {offsets = [0, 64], sizes = [8, 32], strides = [1, 1]} : vector<8x96xf32> to vector<8x32xf32>
    %109 = arith.mulf %98, %108 : vector<8x32xf32>
    %110 = arith.addf %107, %109 : vector<8x32xf32>
    %111 = math.tanh %110 : vector<8x32xf32>
    %cst_38 = arith.constant 1.000000e+00 : f32
    %112 = vector.broadcast %cst_38 : f32 to vector<8x32xf32>
    %113 = arith.subf %112, %106 : vector<8x32xf32>
    %114 = arith.mulf %113, %111 : vector<8x32xf32>
    %115 = arith.mulf %106, %47 : vector<8x32xf32>
    %116 = arith.addf %114, %115 : vector<8x32xf32>
    %117 = tpu.concatenate %116, %73 in 1 : vector<8x32xf32>, vector<8x32xf32> -> vector<8x64xf32>
    %cst_39 = arith.constant dense<0.000000e+00> : vector<8x128xf32>
    %118 = tpu.matmul %117, %9, %cst_39 {dimension_numbers = #tpu.dot_dimension_numbers<[1], [0], [0], [1], [0, 0, 1, 1], [], []>} : vector<8x64xf32>, vector<64x128xf32>, vector<8x128xf32> -> vector<8x128xf32>
    %119 = vector.broadcast %11 : vector<1x128xf32> to vector<8x128xf32>
    %120 = arith.addf %118, %119 : vector<8x128xf32>
    %121 = vector.extract_strided_slice %120 {offsets = [0, 0], sizes = [8, 32], strides = [1, 1]} : vector<8x128xf32> to vector<8x32xf32>
    %122 = arith.negf %121 : vector<8x32xf32>
    %123 = math.exp %122 : vector<8x32xf32>
    %cst_40 = arith.constant 1.000000e+00 : f32
    %124 = vector.broadcast %cst_40 : f32 to vector<8x32xf32>
    %125 = arith.addf %124, %123 : vector<8x32xf32>
    %126 = arith.divf %124, %125 : vector<8x32xf32>
    %127 = vector.extract_strided_slice %120 {offsets = [0, 32], sizes = [8, 32], strides = [1, 1]} : vector<8x128xf32> to vector<8x32xf32>
    %128 = arith.negf %127 : vector<8x32xf32>
    %129 = math.exp %128 : vector<8x32xf32>
    %cst_41 = arith.constant 1.000000e+00 : f32
    %130 = vector.broadcast %cst_41 : f32 to vector<8x32xf32>
    %131 = arith.addf %130, %129 : vector<8x32xf32>
    %132 = arith.divf %130, %131 : vector<8x32xf32>
    %133 = vector.extract_strided_slice %120 {offsets = [0, 64], sizes = [8, 32], strides = [1, 1]} : vector<8x128xf32> to vector<8x32xf32>
    %134 = vector.extract_strided_slice %120 {offsets = [0, 96], sizes = [8, 32], strides = [1, 1]} : vector<8x128xf32> to vector<8x32xf32>
    %135 = arith.mulf %126, %134 : vector<8x32xf32>
    %136 = arith.addf %133, %135 : vector<8x32xf32>
    %137 = math.tanh %136 : vector<8x32xf32>
    %cst_42 = arith.constant 1.000000e+00 : f32
    %138 = vector.broadcast %cst_42 : f32 to vector<8x32xf32>
    %139 = arith.subf %138, %132 : vector<8x32xf32>
    %140 = arith.mulf %139, %137 : vector<8x32xf32>
    %141 = arith.mulf %132, %73 : vector<8x32xf32>
    %142 = arith.addf %140, %141 : vector<8x32xf32>
    %cst_43 = arith.constant dense<0.000000e+00> : vector<8x16xf32>
    %143 = tpu.matmul %142, %12, %cst_43 {dimension_numbers = #tpu.dot_dimension_numbers<[1], [0], [0], [1], [0, 0, 1, 1], [], []>} : vector<8x32xf32>, vector<32x16xf32>, vector<8x16xf32> -> vector<8x16xf32>
    %144 = vector.broadcast %13 : vector<1x16xf32> to vector<8x16xf32>
    %145 = arith.addf %143, %144 : vector<8x16xf32>
    %cst_44 = arith.constant dense<0xFF800000> : vector<8xf32>
    %146 = vector.multi_reduction <maximumf>, %145, %cst_44 [1] : vector<8x16xf32> to vector<8xf32>
    %147 = vector.shape_cast %146 : vector<8xf32> to vector<8x1xf32>
    %148 = vector.broadcast %147 : vector<8x1xf32> to vector<8x16xf32>
    %149 = arith.subf %145, %148 : vector<8x16xf32>
    %150 = math.exp %149 : vector<8x16xf32>
    %cst_45 = arith.constant dense<0.000000e+00> : vector<8xf32>
    %151 = vector.multi_reduction <add>, %150, %cst_45 [1] : vector<8x16xf32> to vector<8xf32>
    %152 = vector.shape_cast %151 : vector<8xf32> to vector<8x1xf32>
    %153 = math.log %152 : vector<8x1xf32>
    %154 = vector.broadcast %153 : vector<8x1xf32> to vector<8x16xf32>
    %155 = arith.subf %149, %154 : vector<8x16xf32>
    %156 = vector.extract_strided_slice %5 {offsets = [16, 0], sizes = [8, 96], strides = [1, 1]} : vector<64x96xf32> to vector<8x96xf32>
    %cst_46 = arith.constant dense<0.000000e+00> : vector<8x96xf32>
    %157 = tpu.matmul %116, %6, %cst_46 {dimension_numbers = #tpu.dot_dimension_numbers<[1], [0], [0], [1], [0, 0, 1, 1], [], []>} : vector<8x32xf32>, vector<32x96xf32>, vector<8x96xf32> -> vector<8x96xf32>
    %158 = vector.broadcast %7 : vector<1x96xf32> to vector<8x96xf32>
    %159 = arith.addf %157, %158 : vector<8x96xf32>
    %160 = vector.extract_strided_slice %156 {offsets = [0, 0], sizes = [8, 32], strides = [1, 1]} : vector<8x96xf32> to vector<8x32xf32>
    %161 = vector.extract_strided_slice %159 {offsets = [0, 0], sizes = [8, 32], strides = [1, 1]} : vector<8x96xf32> to vector<8x32xf32>
    %162 = arith.addf %160, %161 : vector<8x32xf32>
    %163 = arith.negf %162 : vector<8x32xf32>
    %164 = math.exp %163 : vector<8x32xf32>
    %cst_47 = arith.constant 1.000000e+00 : f32
    %165 = vector.broadcast %cst_47 : f32 to vector<8x32xf32>
    %166 = arith.addf %165, %164 : vector<8x32xf32>
    %167 = arith.divf %165, %166 : vector<8x32xf32>
    %168 = vector.extract_strided_slice %156 {offsets = [0, 32], sizes = [8, 32], strides = [1, 1]} : vector<8x96xf32> to vector<8x32xf32>
    %169 = vector.extract_strided_slice %159 {offsets = [0, 32], sizes = [8, 32], strides = [1, 1]} : vector<8x96xf32> to vector<8x32xf32>
    %170 = arith.addf %168, %169 : vector<8x32xf32>
    %171 = arith.negf %170 : vector<8x32xf32>
    %172 = math.exp %171 : vector<8x32xf32>
    %cst_48 = arith.constant 1.000000e+00 : f32
    %173 = vector.broadcast %cst_48 : f32 to vector<8x32xf32>
    %174 = arith.addf %173, %172 : vector<8x32xf32>
    %175 = arith.divf %173, %174 : vector<8x32xf32>
    %176 = vector.extract_strided_slice %156 {offsets = [0, 64], sizes = [8, 32], strides = [1, 1]} : vector<8x96xf32> to vector<8x32xf32>
    %177 = vector.extract_strided_slice %159 {offsets = [0, 64], sizes = [8, 32], strides = [1, 1]} : vector<8x96xf32> to vector<8x32xf32>
    %178 = arith.mulf %167, %177 : vector<8x32xf32>
    %179 = arith.addf %176, %178 : vector<8x32xf32>
    %180 = math.tanh %179 : vector<8x32xf32>
    %cst_49 = arith.constant 1.000000e+00 : f32
    %181 = vector.broadcast %cst_49 : f32 to vector<8x32xf32>
    %182 = arith.subf %181, %175 : vector<8x32xf32>
    %183 = arith.mulf %182, %180 : vector<8x32xf32>
    %184 = arith.mulf %175, %116 : vector<8x32xf32>
    %185 = arith.addf %183, %184 : vector<8x32xf32>
    %186 = tpu.concatenate %185, %142 in 1 : vector<8x32xf32>, vector<8x32xf32> -> vector<8x64xf32>
    %cst_50 = arith.constant dense<0.000000e+00> : vector<8x128xf32>
    %187 = tpu.matmul %186, %9, %cst_50 {dimension_numbers = #tpu.dot_dimension_numbers<[1], [0], [0], [1], [0, 0, 1, 1], [], []>} : vector<8x64xf32>, vector<64x128xf32>, vector<8x128xf32> -> vector<8x128xf32>
    %188 = vector.broadcast %11 : vector<1x128xf32> to vector<8x128xf32>
    %189 = arith.addf %187, %188 : vector<8x128xf32>
    %190 = vector.extract_strided_slice %189 {offsets = [0, 0], sizes = [8, 32], strides = [1, 1]} : vector<8x128xf32> to vector<8x32xf32>
    %191 = arith.negf %190 : vector<8x32xf32>
    %192 = math.exp %191 : vector<8x32xf32>
    %cst_51 = arith.constant 1.000000e+00 : f32
    %193 = vector.broadcast %cst_51 : f32 to vector<8x32xf32>
    %194 = arith.addf %193, %192 : vector<8x32xf32>
    %195 = arith.divf %193, %194 : vector<8x32xf32>
    %196 = vector.extract_strided_slice %189 {offsets = [0, 32], sizes = [8, 32], strides = [1, 1]} : vector<8x128xf32> to vector<8x32xf32>
    %197 = arith.negf %196 : vector<8x32xf32>
    %198 = math.exp %197 : vector<8x32xf32>
    %cst_52 = arith.constant 1.000000e+00 : f32
    %199 = vector.broadcast %cst_52 : f32 to vector<8x32xf32>
    %200 = arith.addf %199, %198 : vector<8x32xf32>
    %201 = arith.divf %199, %200 : vector<8x32xf32>
    %202 = vector.extract_strided_slice %189 {offsets = [0, 64], sizes = [8, 32], strides = [1, 1]} : vector<8x128xf32> to vector<8x32xf32>
    %203 = vector.extract_strided_slice %189 {offsets = [0, 96], sizes = [8, 32], strides = [1, 1]} : vector<8x128xf32> to vector<8x32xf32>
    %204 = arith.mulf %195, %203 : vector<8x32xf32>
    %205 = arith.addf %202, %204 : vector<8x32xf32>
    %206 = math.tanh %205 : vector<8x32xf32>
    %cst_53 = arith.constant 1.000000e+00 : f32
    %207 = vector.broadcast %cst_53 : f32 to vector<8x32xf32>
    %208 = arith.subf %207, %201 : vector<8x32xf32>
    %209 = arith.mulf %208, %206 : vector<8x32xf32>
    %210 = arith.mulf %201, %142 : vector<8x32xf32>
    %211 = arith.addf %209, %210 : vector<8x32xf32>
    %cst_54 = arith.constant dense<0.000000e+00> : vector<8x16xf32>
    %212 = tpu.matmul %211, %12, %cst_54 {dimension_numbers = #tpu.dot_dimension_numbers<[1], [0], [0], [1], [0, 0, 1, 1], [], []>} : vector<8x32xf32>, vector<32x16xf32>, vector<8x16xf32> -> vector<8x16xf32>
    %213 = vector.broadcast %13 : vector<1x16xf32> to vector<8x16xf32>
    %214 = arith.addf %212, %213 : vector<8x16xf32>
    %cst_55 = arith.constant dense<0xFF800000> : vector<8xf32>
    %215 = vector.multi_reduction <maximumf>, %214, %cst_55 [1] : vector<8x16xf32> to vector<8xf32>
    %216 = vector.shape_cast %215 : vector<8xf32> to vector<8x1xf32>
    %217 = vector.broadcast %216 : vector<8x1xf32> to vector<8x16xf32>
    %218 = arith.subf %214, %217 : vector<8x16xf32>
    %219 = math.exp %218 : vector<8x16xf32>
    %cst_56 = arith.constant dense<0.000000e+00> : vector<8xf32>
    %220 = vector.multi_reduction <add>, %219, %cst_56 [1] : vector<8x16xf32> to vector<8xf32>
    %221 = vector.shape_cast %220 : vector<8xf32> to vector<8x1xf32>
    %222 = math.log %221 : vector<8x1xf32>
    %223 = vector.broadcast %222 : vector<8x1xf32> to vector<8x16xf32>
    %224 = arith.subf %218, %223 : vector<8x16xf32>
    %225 = vector.extract_strided_slice %5 {offsets = [24, 0], sizes = [8, 96], strides = [1, 1]} : vector<64x96xf32> to vector<8x96xf32>
    %cst_57 = arith.constant dense<0.000000e+00> : vector<8x96xf32>
    %226 = tpu.matmul %185, %6, %cst_57 {dimension_numbers = #tpu.dot_dimension_numbers<[1], [0], [0], [1], [0, 0, 1, 1], [], []>} : vector<8x32xf32>, vector<32x96xf32>, vector<8x96xf32> -> vector<8x96xf32>
    %227 = vector.broadcast %7 : vector<1x96xf32> to vector<8x96xf32>
    %228 = arith.addf %226, %227 : vector<8x96xf32>
    %229 = vector.extract_strided_slice %225 {offsets = [0, 0], sizes = [8, 32], strides = [1, 1]} : vector<8x96xf32> to vector<8x32xf32>
    %230 = vector.extract_strided_slice %228 {offsets = [0, 0], sizes = [8, 32], strides = [1, 1]} : vector<8x96xf32> to vector<8x32xf32>
    %231 = arith.addf %229, %230 : vector<8x32xf32>
    %232 = arith.negf %231 : vector<8x32xf32>
    %233 = math.exp %232 : vector<8x32xf32>
    %cst_58 = arith.constant 1.000000e+00 : f32
    %234 = vector.broadcast %cst_58 : f32 to vector<8x32xf32>
    %235 = arith.addf %234, %233 : vector<8x32xf32>
    %236 = arith.divf %234, %235 : vector<8x32xf32>
    %237 = vector.extract_strided_slice %225 {offsets = [0, 32], sizes = [8, 32], strides = [1, 1]} : vector<8x96xf32> to vector<8x32xf32>
    %238 = vector.extract_strided_slice %228 {offsets = [0, 32], sizes = [8, 32], strides = [1, 1]} : vector<8x96xf32> to vector<8x32xf32>
    %239 = arith.addf %237, %238 : vector<8x32xf32>
    %240 = arith.negf %239 : vector<8x32xf32>
    %241 = math.exp %240 : vector<8x32xf32>
    %cst_59 = arith.constant 1.000000e+00 : f32
    %242 = vector.broadcast %cst_59 : f32 to vector<8x32xf32>
    %243 = arith.addf %242, %241 : vector<8x32xf32>
    %244 = arith.divf %242, %243 : vector<8x32xf32>
    %245 = vector.extract_strided_slice %225 {offsets = [0, 64], sizes = [8, 32], strides = [1, 1]} : vector<8x96xf32> to vector<8x32xf32>
    %246 = vector.extract_strided_slice %228 {offsets = [0, 64], sizes = [8, 32], strides = [1, 1]} : vector<8x96xf32> to vector<8x32xf32>
    %247 = arith.mulf %236, %246 : vector<8x32xf32>
    %248 = arith.addf %245, %247 : vector<8x32xf32>
    %249 = math.tanh %248 : vector<8x32xf32>
    %cst_60 = arith.constant 1.000000e+00 : f32
    %250 = vector.broadcast %cst_60 : f32 to vector<8x32xf32>
    %251 = arith.subf %250, %244 : vector<8x32xf32>
    %252 = arith.mulf %251, %249 : vector<8x32xf32>
    %253 = arith.mulf %244, %185 : vector<8x32xf32>
    %254 = arith.addf %252, %253 : vector<8x32xf32>
    %255 = tpu.concatenate %254, %211 in 1 : vector<8x32xf32>, vector<8x32xf32> -> vector<8x64xf32>
    %cst_61 = arith.constant dense<0.000000e+00> : vector<8x128xf32>
    %256 = tpu.matmul %255, %9, %cst_61 {dimension_numbers = #tpu.dot_dimension_numbers<[1], [0], [0], [1], [0, 0, 1, 1], [], []>} : vector<8x64xf32>, vector<64x128xf32>, vector<8x128xf32> -> vector<8x128xf32>
    %257 = vector.broadcast %11 : vector<1x128xf32> to vector<8x128xf32>
    %258 = arith.addf %256, %257 : vector<8x128xf32>
    %259 = vector.extract_strided_slice %258 {offsets = [0, 0], sizes = [8, 32], strides = [1, 1]} : vector<8x128xf32> to vector<8x32xf32>
    %260 = arith.negf %259 : vector<8x32xf32>
    %261 = math.exp %260 : vector<8x32xf32>
    %cst_62 = arith.constant 1.000000e+00 : f32
    %262 = vector.broadcast %cst_62 : f32 to vector<8x32xf32>
    %263 = arith.addf %262, %261 : vector<8x32xf32>
    %264 = arith.divf %262, %263 : vector<8x32xf32>
    %265 = vector.extract_strided_slice %258 {offsets = [0, 32], sizes = [8, 32], strides = [1, 1]} : vector<8x128xf32> to vector<8x32xf32>
    %266 = arith.negf %265 : vector<8x32xf32>
    %267 = math.exp %266 : vector<8x32xf32>
    %cst_63 = arith.constant 1.000000e+00 : f32
    %268 = vector.broadcast %cst_63 : f32 to vector<8x32xf32>
    %269 = arith.addf %268, %267 : vector<8x32xf32>
    %270 = arith.divf %268, %269 : vector<8x32xf32>
    %271 = vector.extract_strided_slice %258 {offsets = [0, 64], sizes = [8, 32], strides = [1, 1]} : vector<8x128xf32> to vector<8x32xf32>
    %272 = vector.extract_strided_slice %258 {offsets = [0, 96], sizes = [8, 32], strides = [1, 1]} : vector<8x128xf32> to vector<8x32xf32>
    %273 = arith.mulf %264, %272 : vector<8x32xf32>
    %274 = arith.addf %271, %273 : vector<8x32xf32>
    %275 = math.tanh %274 : vector<8x32xf32>
    %cst_64 = arith.constant 1.000000e+00 : f32
    %276 = vector.broadcast %cst_64 : f32 to vector<8x32xf32>
    %277 = arith.subf %276, %270 : vector<8x32xf32>
    %278 = arith.mulf %277, %275 : vector<8x32xf32>
    %279 = arith.mulf %270, %211 : vector<8x32xf32>
    %280 = arith.addf %278, %279 : vector<8x32xf32>
    %cst_65 = arith.constant dense<0.000000e+00> : vector<8x16xf32>
    %281 = tpu.matmul %280, %12, %cst_65 {dimension_numbers = #tpu.dot_dimension_numbers<[1], [0], [0], [1], [0, 0, 1, 1], [], []>} : vector<8x32xf32>, vector<32x16xf32>, vector<8x16xf32> -> vector<8x16xf32>
    %282 = vector.broadcast %13 : vector<1x16xf32> to vector<8x16xf32>
    %283 = arith.addf %281, %282 : vector<8x16xf32>
    %cst_66 = arith.constant dense<0xFF800000> : vector<8xf32>
    %284 = vector.multi_reduction <maximumf>, %283, %cst_66 [1] : vector<8x16xf32> to vector<8xf32>
    %285 = vector.shape_cast %284 : vector<8xf32> to vector<8x1xf32>
    %286 = vector.broadcast %285 : vector<8x1xf32> to vector<8x16xf32>
    %287 = arith.subf %283, %286 : vector<8x16xf32>
    %288 = math.exp %287 : vector<8x16xf32>
    %cst_67 = arith.constant dense<0.000000e+00> : vector<8xf32>
    %289 = vector.multi_reduction <add>, %288, %cst_67 [1] : vector<8x16xf32> to vector<8xf32>
    %290 = vector.shape_cast %289 : vector<8xf32> to vector<8x1xf32>
    %291 = math.log %290 : vector<8x1xf32>
    %292 = vector.broadcast %291 : vector<8x1xf32> to vector<8x16xf32>
    %293 = arith.subf %287, %292 : vector<8x16xf32>
    %294 = vector.extract_strided_slice %5 {offsets = [32, 0], sizes = [8, 96], strides = [1, 1]} : vector<64x96xf32> to vector<8x96xf32>
    %cst_68 = arith.constant dense<0.000000e+00> : vector<8x96xf32>
    %295 = tpu.matmul %254, %6, %cst_68 {dimension_numbers = #tpu.dot_dimension_numbers<[1], [0], [0], [1], [0, 0, 1, 1], [], []>} : vector<8x32xf32>, vector<32x96xf32>, vector<8x96xf32> -> vector<8x96xf32>
    %296 = vector.broadcast %7 : vector<1x96xf32> to vector<8x96xf32>
    %297 = arith.addf %295, %296 : vector<8x96xf32>
    %298 = vector.extract_strided_slice %294 {offsets = [0, 0], sizes = [8, 32], strides = [1, 1]} : vector<8x96xf32> to vector<8x32xf32>
    %299 = vector.extract_strided_slice %297 {offsets = [0, 0], sizes = [8, 32], strides = [1, 1]} : vector<8x96xf32> to vector<8x32xf32>
    %300 = arith.addf %298, %299 : vector<8x32xf32>
    %301 = arith.negf %300 : vector<8x32xf32>
    %302 = math.exp %301 : vector<8x32xf32>
    %cst_69 = arith.constant 1.000000e+00 : f32
    %303 = vector.broadcast %cst_69 : f32 to vector<8x32xf32>
    %304 = arith.addf %303, %302 : vector<8x32xf32>
    %305 = arith.divf %303, %304 : vector<8x32xf32>
    %306 = vector.extract_strided_slice %294 {offsets = [0, 32], sizes = [8, 32], strides = [1, 1]} : vector<8x96xf32> to vector<8x32xf32>
    %307 = vector.extract_strided_slice %297 {offsets = [0, 32], sizes = [8, 32], strides = [1, 1]} : vector<8x96xf32> to vector<8x32xf32>
    %308 = arith.addf %306, %307 : vector<8x32xf32>
    %309 = arith.negf %308 : vector<8x32xf32>
    %310 = math.exp %309 : vector<8x32xf32>
    %cst_70 = arith.constant 1.000000e+00 : f32
    %311 = vector.broadcast %cst_70 : f32 to vector<8x32xf32>
    %312 = arith.addf %311, %310 : vector<8x32xf32>
    %313 = arith.divf %311, %312 : vector<8x32xf32>
    %314 = vector.extract_strided_slice %294 {offsets = [0, 64], sizes = [8, 32], strides = [1, 1]} : vector<8x96xf32> to vector<8x32xf32>
    %315 = vector.extract_strided_slice %297 {offsets = [0, 64], sizes = [8, 32], strides = [1, 1]} : vector<8x96xf32> to vector<8x32xf32>
    %316 = arith.mulf %305, %315 : vector<8x32xf32>
    %317 = arith.addf %314, %316 : vector<8x32xf32>
    %318 = math.tanh %317 : vector<8x32xf32>
    %cst_71 = arith.constant 1.000000e+00 : f32
    %319 = vector.broadcast %cst_71 : f32 to vector<8x32xf32>
    %320 = arith.subf %319, %313 : vector<8x32xf32>
    %321 = arith.mulf %320, %318 : vector<8x32xf32>
    %322 = arith.mulf %313, %254 : vector<8x32xf32>
    %323 = arith.addf %321, %322 : vector<8x32xf32>
    %324 = tpu.concatenate %323, %280 in 1 : vector<8x32xf32>, vector<8x32xf32> -> vector<8x64xf32>
    %cst_72 = arith.constant dense<0.000000e+00> : vector<8x128xf32>
    %325 = tpu.matmul %324, %9, %cst_72 {dimension_numbers = #tpu.dot_dimension_numbers<[1], [0], [0], [1], [0, 0, 1, 1], [], []>} : vector<8x64xf32>, vector<64x128xf32>, vector<8x128xf32> -> vector<8x128xf32>
    %326 = vector.broadcast %11 : vector<1x128xf32> to vector<8x128xf32>
    %327 = arith.addf %325, %326 : vector<8x128xf32>
    %328 = vector.extract_strided_slice %327 {offsets = [0, 0], sizes = [8, 32], strides = [1, 1]} : vector<8x128xf32> to vector<8x32xf32>
    %329 = arith.negf %328 : vector<8x32xf32>
    %330 = math.exp %329 : vector<8x32xf32>
    %cst_73 = arith.constant 1.000000e+00 : f32
    %331 = vector.broadcast %cst_73 : f32 to vector<8x32xf32>
    %332 = arith.addf %331, %330 : vector<8x32xf32>
    %333 = arith.divf %331, %332 : vector<8x32xf32>
    %334 = vector.extract_strided_slice %327 {offsets = [0, 32], sizes = [8, 32], strides = [1, 1]} : vector<8x128xf32> to vector<8x32xf32>
    %335 = arith.negf %334 : vector<8x32xf32>
    %336 = math.exp %335 : vector<8x32xf32>
    %cst_74 = arith.constant 1.000000e+00 : f32
    %337 = vector.broadcast %cst_74 : f32 to vector<8x32xf32>
    %338 = arith.addf %337, %336 : vector<8x32xf32>
    %339 = arith.divf %337, %338 : vector<8x32xf32>
    %340 = vector.extract_strided_slice %327 {offsets = [0, 64], sizes = [8, 32], strides = [1, 1]} : vector<8x128xf32> to vector<8x32xf32>
    %341 = vector.extract_strided_slice %327 {offsets = [0, 96], sizes = [8, 32], strides = [1, 1]} : vector<8x128xf32> to vector<8x32xf32>
    %342 = arith.mulf %333, %341 : vector<8x32xf32>
    %343 = arith.addf %340, %342 : vector<8x32xf32>
    %344 = math.tanh %343 : vector<8x32xf32>
    %cst_75 = arith.constant 1.000000e+00 : f32
    %345 = vector.broadcast %cst_75 : f32 to vector<8x32xf32>
    %346 = arith.subf %345, %339 : vector<8x32xf32>
    %347 = arith.mulf %346, %344 : vector<8x32xf32>
    %348 = arith.mulf %339, %280 : vector<8x32xf32>
    %349 = arith.addf %347, %348 : vector<8x32xf32>
    %cst_76 = arith.constant dense<0.000000e+00> : vector<8x16xf32>
    %350 = tpu.matmul %349, %12, %cst_76 {dimension_numbers = #tpu.dot_dimension_numbers<[1], [0], [0], [1], [0, 0, 1, 1], [], []>} : vector<8x32xf32>, vector<32x16xf32>, vector<8x16xf32> -> vector<8x16xf32>
    %351 = vector.broadcast %13 : vector<1x16xf32> to vector<8x16xf32>
    %352 = arith.addf %350, %351 : vector<8x16xf32>
    %cst_77 = arith.constant dense<0xFF800000> : vector<8xf32>
    %353 = vector.multi_reduction <maximumf>, %352, %cst_77 [1] : vector<8x16xf32> to vector<8xf32>
    %354 = vector.shape_cast %353 : vector<8xf32> to vector<8x1xf32>
    %355 = vector.broadcast %354 : vector<8x1xf32> to vector<8x16xf32>
    %356 = arith.subf %352, %355 : vector<8x16xf32>
    %357 = math.exp %356 : vector<8x16xf32>
    %cst_78 = arith.constant dense<0.000000e+00> : vector<8xf32>
    %358 = vector.multi_reduction <add>, %357, %cst_78 [1] : vector<8x16xf32> to vector<8xf32>
    %359 = vector.shape_cast %358 : vector<8xf32> to vector<8x1xf32>
    %360 = math.log %359 : vector<8x1xf32>
    %361 = vector.broadcast %360 : vector<8x1xf32> to vector<8x16xf32>
    %362 = arith.subf %356, %361 : vector<8x16xf32>
    %363 = vector.extract_strided_slice %5 {offsets = [40, 0], sizes = [8, 96], strides = [1, 1]} : vector<64x96xf32> to vector<8x96xf32>
    %cst_79 = arith.constant dense<0.000000e+00> : vector<8x96xf32>
    %364 = tpu.matmul %323, %6, %cst_79 {dimension_numbers = #tpu.dot_dimension_numbers<[1], [0], [0], [1], [0, 0, 1, 1], [], []>} : vector<8x32xf32>, vector<32x96xf32>, vector<8x96xf32> -> vector<8x96xf32>
    %365 = vector.broadcast %7 : vector<1x96xf32> to vector<8x96xf32>
    %366 = arith.addf %364, %365 : vector<8x96xf32>
    %367 = vector.extract_strided_slice %363 {offsets = [0, 0], sizes = [8, 32], strides = [1, 1]} : vector<8x96xf32> to vector<8x32xf32>
    %368 = vector.extract_strided_slice %366 {offsets = [0, 0], sizes = [8, 32], strides = [1, 1]} : vector<8x96xf32> to vector<8x32xf32>
    %369 = arith.addf %367, %368 : vector<8x32xf32>
    %370 = arith.negf %369 : vector<8x32xf32>
    %371 = math.exp %370 : vector<8x32xf32>
    %cst_80 = arith.constant 1.000000e+00 : f32
    %372 = vector.broadcast %cst_80 : f32 to vector<8x32xf32>
    %373 = arith.addf %372, %371 : vector<8x32xf32>
    %374 = arith.divf %372, %373 : vector<8x32xf32>
    %375 = vector.extract_strided_slice %363 {offsets = [0, 32], sizes = [8, 32], strides = [1, 1]} : vector<8x96xf32> to vector<8x32xf32>
    %376 = vector.extract_strided_slice %366 {offsets = [0, 32], sizes = [8, 32], strides = [1, 1]} : vector<8x96xf32> to vector<8x32xf32>
    %377 = arith.addf %375, %376 : vector<8x32xf32>
    %378 = arith.negf %377 : vector<8x32xf32>
    %379 = math.exp %378 : vector<8x32xf32>
    %cst_81 = arith.constant 1.000000e+00 : f32
    %380 = vector.broadcast %cst_81 : f32 to vector<8x32xf32>
    %381 = arith.addf %380, %379 : vector<8x32xf32>
    %382 = arith.divf %380, %381 : vector<8x32xf32>
    %383 = vector.extract_strided_slice %363 {offsets = [0, 64], sizes = [8, 32], strides = [1, 1]} : vector<8x96xf32> to vector<8x32xf32>
    %384 = vector.extract_strided_slice %366 {offsets = [0, 64], sizes = [8, 32], strides = [1, 1]} : vector<8x96xf32> to vector<8x32xf32>
    %385 = arith.mulf %374, %384 : vector<8x32xf32>
    %386 = arith.addf %383, %385 : vector<8x32xf32>
    %387 = math.tanh %386 : vector<8x32xf32>
    %cst_82 = arith.constant 1.000000e+00 : f32
    %388 = vector.broadcast %cst_82 : f32 to vector<8x32xf32>
    %389 = arith.subf %388, %382 : vector<8x32xf32>
    %390 = arith.mulf %389, %387 : vector<8x32xf32>
    %391 = arith.mulf %382, %323 : vector<8x32xf32>
    %392 = arith.addf %390, %391 : vector<8x32xf32>
    %393 = tpu.concatenate %392, %349 in 1 : vector<8x32xf32>, vector<8x32xf32> -> vector<8x64xf32>
    %cst_83 = arith.constant dense<0.000000e+00> : vector<8x128xf32>
    %394 = tpu.matmul %393, %9, %cst_83 {dimension_numbers = #tpu.dot_dimension_numbers<[1], [0], [0], [1], [0, 0, 1, 1], [], []>} : vector<8x64xf32>, vector<64x128xf32>, vector<8x128xf32> -> vector<8x128xf32>
    %395 = vector.broadcast %11 : vector<1x128xf32> to vector<8x128xf32>
    %396 = arith.addf %394, %395 : vector<8x128xf32>
    %397 = vector.extract_strided_slice %396 {offsets = [0, 0], sizes = [8, 32], strides = [1, 1]} : vector<8x128xf32> to vector<8x32xf32>
    %398 = arith.negf %397 : vector<8x32xf32>
    %399 = math.exp %398 : vector<8x32xf32>
    %cst_84 = arith.constant 1.000000e+00 : f32
    %400 = vector.broadcast %cst_84 : f32 to vector<8x32xf32>
    %401 = arith.addf %400, %399 : vector<8x32xf32>
    %402 = arith.divf %400, %401 : vector<8x32xf32>
    %403 = vector.extract_strided_slice %396 {offsets = [0, 32], sizes = [8, 32], strides = [1, 1]} : vector<8x128xf32> to vector<8x32xf32>
    %404 = arith.negf %403 : vector<8x32xf32>
    %405 = math.exp %404 : vector<8x32xf32>
    %cst_85 = arith.constant 1.000000e+00 : f32
    %406 = vector.broadcast %cst_85 : f32 to vector<8x32xf32>
    %407 = arith.addf %406, %405 : vector<8x32xf32>
    %408 = arith.divf %406, %407 : vector<8x32xf32>
    %409 = vector.extract_strided_slice %396 {offsets = [0, 64], sizes = [8, 32], strides = [1, 1]} : vector<8x128xf32> to vector<8x32xf32>
    %410 = vector.extract_strided_slice %396 {offsets = [0, 96], sizes = [8, 32], strides = [1, 1]} : vector<8x128xf32> to vector<8x32xf32>
    %411 = arith.mulf %402, %410 : vector<8x32xf32>
    %412 = arith.addf %409, %411 : vector<8x32xf32>
    %413 = math.tanh %412 : vector<8x32xf32>
    %cst_86 = arith.constant 1.000000e+00 : f32
    %414 = vector.broadcast %cst_86 : f32 to vector<8x32xf32>
    %415 = arith.subf %414, %408 : vector<8x32xf32>
    %416 = arith.mulf %415, %413 : vector<8x32xf32>
    %417 = arith.mulf %408, %349 : vector<8x32xf32>
    %418 = arith.addf %416, %417 : vector<8x32xf32>
    %cst_87 = arith.constant dense<0.000000e+00> : vector<8x16xf32>
    %419 = tpu.matmul %418, %12, %cst_87 {dimension_numbers = #tpu.dot_dimension_numbers<[1], [0], [0], [1], [0, 0, 1, 1], [], []>} : vector<8x32xf32>, vector<32x16xf32>, vector<8x16xf32> -> vector<8x16xf32>
    %420 = vector.broadcast %13 : vector<1x16xf32> to vector<8x16xf32>
    %421 = arith.addf %419, %420 : vector<8x16xf32>
    %cst_88 = arith.constant dense<0xFF800000> : vector<8xf32>
    %422 = vector.multi_reduction <maximumf>, %421, %cst_88 [1] : vector<8x16xf32> to vector<8xf32>
    %423 = vector.shape_cast %422 : vector<8xf32> to vector<8x1xf32>
    %424 = vector.broadcast %423 : vector<8x1xf32> to vector<8x16xf32>
    %425 = arith.subf %421, %424 : vector<8x16xf32>
    %426 = math.exp %425 : vector<8x16xf32>
    %cst_89 = arith.constant dense<0.000000e+00> : vector<8xf32>
    %427 = vector.multi_reduction <add>, %426, %cst_89 [1] : vector<8x16xf32> to vector<8xf32>
    %428 = vector.shape_cast %427 : vector<8xf32> to vector<8x1xf32>
    %429 = math.log %428 : vector<8x1xf32>
    %430 = vector.broadcast %429 : vector<8x1xf32> to vector<8x16xf32>
    %431 = arith.subf %425, %430 : vector<8x16xf32>
    %432 = vector.extract_strided_slice %5 {offsets = [48, 0], sizes = [8, 96], strides = [1, 1]} : vector<64x96xf32> to vector<8x96xf32>
    %cst_90 = arith.constant dense<0.000000e+00> : vector<8x96xf32>
    %433 = tpu.matmul %392, %6, %cst_90 {dimension_numbers = #tpu.dot_dimension_numbers<[1], [0], [0], [1], [0, 0, 1, 1], [], []>} : vector<8x32xf32>, vector<32x96xf32>, vector<8x96xf32> -> vector<8x96xf32>
    %434 = vector.broadcast %7 : vector<1x96xf32> to vector<8x96xf32>
    %435 = arith.addf %433, %434 : vector<8x96xf32>
    %436 = vector.extract_strided_slice %432 {offsets = [0, 0], sizes = [8, 32], strides = [1, 1]} : vector<8x96xf32> to vector<8x32xf32>
    %437 = vector.extract_strided_slice %435 {offsets = [0, 0], sizes = [8, 32], strides = [1, 1]} : vector<8x96xf32> to vector<8x32xf32>
    %438 = arith.addf %436, %437 : vector<8x32xf32>
    %439 = arith.negf %438 : vector<8x32xf32>
    %440 = math.exp %439 : vector<8x32xf32>
    %cst_91 = arith.constant 1.000000e+00 : f32
    %441 = vector.broadcast %cst_91 : f32 to vector<8x32xf32>
    %442 = arith.addf %441, %440 : vector<8x32xf32>
    %443 = arith.divf %441, %442 : vector<8x32xf32>
    %444 = vector.extract_strided_slice %432 {offsets = [0, 32], sizes = [8, 32], strides = [1, 1]} : vector<8x96xf32> to vector<8x32xf32>
    %445 = vector.extract_strided_slice %435 {offsets = [0, 32], sizes = [8, 32], strides = [1, 1]} : vector<8x96xf32> to vector<8x32xf32>
    %446 = arith.addf %444, %445 : vector<8x32xf32>
    %447 = arith.negf %446 : vector<8x32xf32>
    %448 = math.exp %447 : vector<8x32xf32>
    %cst_92 = arith.constant 1.000000e+00 : f32
    %449 = vector.broadcast %cst_92 : f32 to vector<8x32xf32>
    %450 = arith.addf %449, %448 : vector<8x32xf32>
    %451 = arith.divf %449, %450 : vector<8x32xf32>
    %452 = vector.extract_strided_slice %432 {offsets = [0, 64], sizes = [8, 32], strides = [1, 1]} : vector<8x96xf32> to vector<8x32xf32>
    %453 = vector.extract_strided_slice %435 {offsets = [0, 64], sizes = [8, 32], strides = [1, 1]} : vector<8x96xf32> to vector<8x32xf32>
    %454 = arith.mulf %443, %453 : vector<8x32xf32>
    %455 = arith.addf %452, %454 : vector<8x32xf32>
    %456 = math.tanh %455 : vector<8x32xf32>
    %cst_93 = arith.constant 1.000000e+00 : f32
    %457 = vector.broadcast %cst_93 : f32 to vector<8x32xf32>
    %458 = arith.subf %457, %451 : vector<8x32xf32>
    %459 = arith.mulf %458, %456 : vector<8x32xf32>
    %460 = arith.mulf %451, %392 : vector<8x32xf32>
    %461 = arith.addf %459, %460 : vector<8x32xf32>
    %462 = tpu.concatenate %461, %418 in 1 : vector<8x32xf32>, vector<8x32xf32> -> vector<8x64xf32>
    %cst_94 = arith.constant dense<0.000000e+00> : vector<8x128xf32>
    %463 = tpu.matmul %462, %9, %cst_94 {dimension_numbers = #tpu.dot_dimension_numbers<[1], [0], [0], [1], [0, 0, 1, 1], [], []>} : vector<8x64xf32>, vector<64x128xf32>, vector<8x128xf32> -> vector<8x128xf32>
    %464 = vector.broadcast %11 : vector<1x128xf32> to vector<8x128xf32>
    %465 = arith.addf %463, %464 : vector<8x128xf32>
    %466 = vector.extract_strided_slice %465 {offsets = [0, 0], sizes = [8, 32], strides = [1, 1]} : vector<8x128xf32> to vector<8x32xf32>
    %467 = arith.negf %466 : vector<8x32xf32>
    %468 = math.exp %467 : vector<8x32xf32>
    %cst_95 = arith.constant 1.000000e+00 : f32
    %469 = vector.broadcast %cst_95 : f32 to vector<8x32xf32>
    %470 = arith.addf %469, %468 : vector<8x32xf32>
    %471 = arith.divf %469, %470 : vector<8x32xf32>
    %472 = vector.extract_strided_slice %465 {offsets = [0, 32], sizes = [8, 32], strides = [1, 1]} : vector<8x128xf32> to vector<8x32xf32>
    %473 = arith.negf %472 : vector<8x32xf32>
    %474 = math.exp %473 : vector<8x32xf32>
    %cst_96 = arith.constant 1.000000e+00 : f32
    %475 = vector.broadcast %cst_96 : f32 to vector<8x32xf32>
    %476 = arith.addf %475, %474 : vector<8x32xf32>
    %477 = arith.divf %475, %476 : vector<8x32xf32>
    %478 = vector.extract_strided_slice %465 {offsets = [0, 64], sizes = [8, 32], strides = [1, 1]} : vector<8x128xf32> to vector<8x32xf32>
    %479 = vector.extract_strided_slice %465 {offsets = [0, 96], sizes = [8, 32], strides = [1, 1]} : vector<8x128xf32> to vector<8x32xf32>
    %480 = arith.mulf %471, %479 : vector<8x32xf32>
    %481 = arith.addf %478, %480 : vector<8x32xf32>
    %482 = math.tanh %481 : vector<8x32xf32>
    %cst_97 = arith.constant 1.000000e+00 : f32
    %483 = vector.broadcast %cst_97 : f32 to vector<8x32xf32>
    %484 = arith.subf %483, %477 : vector<8x32xf32>
    %485 = arith.mulf %484, %482 : vector<8x32xf32>
    %486 = arith.mulf %477, %418 : vector<8x32xf32>
    %487 = arith.addf %485, %486 : vector<8x32xf32>
    %cst_98 = arith.constant dense<0.000000e+00> : vector<8x16xf32>
    %488 = tpu.matmul %487, %12, %cst_98 {dimension_numbers = #tpu.dot_dimension_numbers<[1], [0], [0], [1], [0, 0, 1, 1], [], []>} : vector<8x32xf32>, vector<32x16xf32>, vector<8x16xf32> -> vector<8x16xf32>
    %489 = vector.broadcast %13 : vector<1x16xf32> to vector<8x16xf32>
    %490 = arith.addf %488, %489 : vector<8x16xf32>
    %cst_99 = arith.constant dense<0xFF800000> : vector<8xf32>
    %491 = vector.multi_reduction <maximumf>, %490, %cst_99 [1] : vector<8x16xf32> to vector<8xf32>
    %492 = vector.shape_cast %491 : vector<8xf32> to vector<8x1xf32>
    %493 = vector.broadcast %492 : vector<8x1xf32> to vector<8x16xf32>
    %494 = arith.subf %490, %493 : vector<8x16xf32>
    %495 = math.exp %494 : vector<8x16xf32>
    %cst_100 = arith.constant dense<0.000000e+00> : vector<8xf32>
    %496 = vector.multi_reduction <add>, %495, %cst_100 [1] : vector<8x16xf32> to vector<8xf32>
    %497 = vector.shape_cast %496 : vector<8xf32> to vector<8x1xf32>
    %498 = math.log %497 : vector<8x1xf32>
    %499 = vector.broadcast %498 : vector<8x1xf32> to vector<8x16xf32>
    %500 = arith.subf %494, %499 : vector<8x16xf32>
    %501 = vector.extract_strided_slice %5 {offsets = [56, 0], sizes = [8, 96], strides = [1, 1]} : vector<64x96xf32> to vector<8x96xf32>
    %cst_101 = arith.constant dense<0.000000e+00> : vector<8x96xf32>
    %502 = tpu.matmul %461, %6, %cst_101 {dimension_numbers = #tpu.dot_dimension_numbers<[1], [0], [0], [1], [0, 0, 1, 1], [], []>} : vector<8x32xf32>, vector<32x96xf32>, vector<8x96xf32> -> vector<8x96xf32>
    %503 = vector.broadcast %7 : vector<1x96xf32> to vector<8x96xf32>
    %504 = arith.addf %502, %503 : vector<8x96xf32>
    %505 = vector.extract_strided_slice %501 {offsets = [0, 0], sizes = [8, 32], strides = [1, 1]} : vector<8x96xf32> to vector<8x32xf32>
    %506 = vector.extract_strided_slice %504 {offsets = [0, 0], sizes = [8, 32], strides = [1, 1]} : vector<8x96xf32> to vector<8x32xf32>
    %507 = arith.addf %505, %506 : vector<8x32xf32>
    %508 = arith.negf %507 : vector<8x32xf32>
    %509 = math.exp %508 : vector<8x32xf32>
    %cst_102 = arith.constant 1.000000e+00 : f32
    %510 = vector.broadcast %cst_102 : f32 to vector<8x32xf32>
    %511 = arith.addf %510, %509 : vector<8x32xf32>
    %512 = arith.divf %510, %511 : vector<8x32xf32>
    %513 = vector.extract_strided_slice %501 {offsets = [0, 32], sizes = [8, 32], strides = [1, 1]} : vector<8x96xf32> to vector<8x32xf32>
    %514 = vector.extract_strided_slice %504 {offsets = [0, 32], sizes = [8, 32], strides = [1, 1]} : vector<8x96xf32> to vector<8x32xf32>
    %515 = arith.addf %513, %514 : vector<8x32xf32>
    %516 = arith.negf %515 : vector<8x32xf32>
    %517 = math.exp %516 : vector<8x32xf32>
    %cst_103 = arith.constant 1.000000e+00 : f32
    %518 = vector.broadcast %cst_103 : f32 to vector<8x32xf32>
    %519 = arith.addf %518, %517 : vector<8x32xf32>
    %520 = arith.divf %518, %519 : vector<8x32xf32>
    %521 = vector.extract_strided_slice %501 {offsets = [0, 64], sizes = [8, 32], strides = [1, 1]} : vector<8x96xf32> to vector<8x32xf32>
    %522 = vector.extract_strided_slice %504 {offsets = [0, 64], sizes = [8, 32], strides = [1, 1]} : vector<8x96xf32> to vector<8x32xf32>
    %523 = arith.mulf %512, %522 : vector<8x32xf32>
    %524 = arith.addf %521, %523 : vector<8x32xf32>
    %525 = math.tanh %524 : vector<8x32xf32>
    %cst_104 = arith.constant 1.000000e+00 : f32
    %526 = vector.broadcast %cst_104 : f32 to vector<8x32xf32>
    %527 = arith.subf %526, %520 : vector<8x32xf32>
    %528 = arith.mulf %527, %525 : vector<8x32xf32>
    %529 = arith.mulf %520, %461 : vector<8x32xf32>
    %530 = arith.addf %528, %529 : vector<8x32xf32>
    %531 = tpu.concatenate %530, %487 in 1 : vector<8x32xf32>, vector<8x32xf32> -> vector<8x64xf32>
    %cst_105 = arith.constant dense<0.000000e+00> : vector<8x128xf32>
    %532 = tpu.matmul %531, %9, %cst_105 {dimension_numbers = #tpu.dot_dimension_numbers<[1], [0], [0], [1], [0, 0, 1, 1], [], []>} : vector<8x64xf32>, vector<64x128xf32>, vector<8x128xf32> -> vector<8x128xf32>
    %533 = vector.broadcast %11 : vector<1x128xf32> to vector<8x128xf32>
    %534 = arith.addf %532, %533 : vector<8x128xf32>
    %535 = vector.extract_strided_slice %534 {offsets = [0, 0], sizes = [8, 32], strides = [1, 1]} : vector<8x128xf32> to vector<8x32xf32>
    %536 = arith.negf %535 : vector<8x32xf32>
    %537 = math.exp %536 : vector<8x32xf32>
    %cst_106 = arith.constant 1.000000e+00 : f32
    %538 = vector.broadcast %cst_106 : f32 to vector<8x32xf32>
    %539 = arith.addf %538, %537 : vector<8x32xf32>
    %540 = arith.divf %538, %539 : vector<8x32xf32>
    %541 = vector.extract_strided_slice %534 {offsets = [0, 32], sizes = [8, 32], strides = [1, 1]} : vector<8x128xf32> to vector<8x32xf32>
    %542 = arith.negf %541 : vector<8x32xf32>
    %543 = math.exp %542 : vector<8x32xf32>
    %cst_107 = arith.constant 1.000000e+00 : f32
    %544 = vector.broadcast %cst_107 : f32 to vector<8x32xf32>
    %545 = arith.addf %544, %543 : vector<8x32xf32>
    %546 = arith.divf %544, %545 : vector<8x32xf32>
    %547 = vector.extract_strided_slice %534 {offsets = [0, 64], sizes = [8, 32], strides = [1, 1]} : vector<8x128xf32> to vector<8x32xf32>
    %548 = vector.extract_strided_slice %534 {offsets = [0, 96], sizes = [8, 32], strides = [1, 1]} : vector<8x128xf32> to vector<8x32xf32>
    %549 = arith.mulf %540, %548 : vector<8x32xf32>
    %550 = arith.addf %547, %549 : vector<8x32xf32>
    %551 = math.tanh %550 : vector<8x32xf32>
    %cst_108 = arith.constant 1.000000e+00 : f32
    %552 = vector.broadcast %cst_108 : f32 to vector<8x32xf32>
    %553 = arith.subf %552, %546 : vector<8x32xf32>
    %554 = arith.mulf %553, %551 : vector<8x32xf32>
    %555 = arith.mulf %546, %487 : vector<8x32xf32>
    %556 = arith.addf %554, %555 : vector<8x32xf32>
    %cst_109 = arith.constant dense<0.000000e+00> : vector<8x16xf32>
    %557 = tpu.matmul %556, %12, %cst_109 {dimension_numbers = #tpu.dot_dimension_numbers<[1], [0], [0], [1], [0, 0, 1, 1], [], []>} : vector<8x32xf32>, vector<32x16xf32>, vector<8x16xf32> -> vector<8x16xf32>
    %558 = vector.broadcast %13 : vector<1x16xf32> to vector<8x16xf32>
    %559 = arith.addf %557, %558 : vector<8x16xf32>
    %cst_110 = arith.constant dense<0xFF800000> : vector<8xf32>
    %560 = vector.multi_reduction <maximumf>, %559, %cst_110 [1] : vector<8x16xf32> to vector<8xf32>
    %561 = vector.shape_cast %560 : vector<8xf32> to vector<8x1xf32>
    %562 = vector.broadcast %561 : vector<8x1xf32> to vector<8x16xf32>
    %563 = arith.subf %559, %562 : vector<8x16xf32>
    %564 = math.exp %563 : vector<8x16xf32>
    %cst_111 = arith.constant dense<0.000000e+00> : vector<8xf32>
    %565 = vector.multi_reduction <add>, %564, %cst_111 [1] : vector<8x16xf32> to vector<8xf32>
    %566 = vector.shape_cast %565 : vector<8xf32> to vector<8x1xf32>
    %567 = math.log %566 : vector<8x1xf32>
    %568 = vector.broadcast %567 : vector<8x1xf32> to vector<8x16xf32>
    %569 = arith.subf %563, %568 : vector<8x16xf32>
    %570 = tpu.concatenate %86, %155, %224, %293, %362, %431, %500, %569 in 1 : vector<8x16xf32>, vector<8x16xf32>, vector<8x16xf32>, vector<8x16xf32>, vector<8x16xf32>, vector<8x16xf32>, vector<8x16xf32>, vector<8x16xf32> -> vector<8x128xf32>
    %c0_112 = arith.constant 0 : index
    %c0_113 = arith.constant 0 : index
    %571 = vector.load %arg10[%c0_112, %c0_113] : memref<8x128xf32, #tpu.memory_space<vmem>>, vector<8x128xf32>
    tpu.vector_store %arg10[%c0_112, %c0_113], %570 {strides = array<i32>} : memref<8x128xf32, #tpu.memory_space<vmem>>, vector<8x128xf32>,
    %c0_114 = arith.constant 0 : index
    %c0_115 = arith.constant 0 : index
    %c0_116 = arith.constant 0 : index
    %572 = vector.load %arg11[%c0_114, %c0_115, %c0_116] : memref<2x8x32xf32, #tpu.memory_space<vmem>>, vector<1x8x32xf32>
    %573 = vector.shape_cast %572 : vector<1x8x32xf32> to vector<8x32xf32>
    %574 = vector.shape_cast %530 : vector<8x32xf32> to vector<1x8x32xf32>
    tpu.vector_store %arg11[%c0_114, %c0_115, %c0_116], %574 {strides = array<i32>} : memref<2x8x32xf32, #tpu.memory_space<vmem>>, vector<1x8x32xf32>,
    %c1_117 = arith.constant 1 : index
    %c0_118 = arith.constant 0 : index
    %c0_119 = arith.constant 0 : index
    %575 = vector.load %arg11[%c1_117, %c0_118, %c0_119] : memref<2x8x32xf32, #tpu.memory_space<vmem>>, vector<1x8x32xf32>
    %576 = vector.shape_cast %575 : vector<1x8x32xf32> to vector<8x32xf32>
    %577 = vector.shape_cast %556 : vector<8x32xf32> to vector<1x8x32xf32>
    tpu.vector_store %arg11[%c1_117, %c0_118, %c0_119], %577 {strides = array<i32>} : memref<2x8x32xf32, #tpu.memory_space<vmem>>, vector<1x8x32xf32>,
    return
  }
}

</mosaic_0001>

<bundles_post_ra>
// kernel: tpu_custom_call.1
= control target key start
LH: loop header
LB: loop body
LE: loop exit
PB: predicated region body
PF: predicated region fallthrough
CT: control target
= control target key end

     0   :  { %17 = vsyncpa [#allocation3], 0  ;;  %s2478_s0 = inlined_call_operand.vmem [shape: f32[64,32], index: 0, kind: input, shape index: {}]   ;;  %s2479_s1 = inlined_call_operand.vmem [shape: f32[2,8,32], index: 1, kind: input, shape index: {}]   ;;  %s2480_s2 = inlined_call_operand.vmem [shape: f32[32,96], index: 2, kind: input, shape index: {}]   ;;  %s2481_s3 = inlined_call_operand.vmem [shape: f32[1,96], index: 3, kind: input, shape index: {}]   ;;  %s2482_s4 = inlined_call_operand.hbm [shape: f32[32,96], index: 4, kind: input, shape index: {}]   ;;  %s2483_s5 = inlined_call_operand.vmem [shape: f32[1,96], index: 5, kind: input, shape index: {}]   ;;  %s2484_s6 = inlined_call_operand.vmem [shape: f32[1,64,128], index: 6, kind: input, shape index: {}]   ;;  %s2485_s7 = inlined_call_operand.vmem [shape: f32[1,1,128], index: 7, kind: input, shape index: {}]   ;;  %s2486_s8 = inlined_call_operand.vmem [shape: f32[32,16], index: 8, kind: input, shape index: {}]   ;;  %s2487_s9 = inlined_call_operand.vmem [shape: f32[1,16], index: 9, kind: input, shape index: {}]   ;;  %s2488_s10 = inlined_call_operand.hbm [shape: f32[8,128], index: 10, kind: output, shape index: {0}]   ;;  %s2489_s11 = inlined_call_operand.hbm [shape: f32[2,8,32], index: 11, kind: output, shape index: {1}]  }
   0x1   :  { %18 = vsyncpa [#allocation4], 0 }
   0x2   :  { %19 = vsyncpa [#allocation7], 0  ;;  %s32_s19 = sshll.u32 %s2482_s4, 4  ;;  %s1851_s20 = smov [#allocation2]   ;;  %s33_s19 = int_to_ptr.hbm [resolvable:$true] %s32_s19 }
   0x3   :  { %s34_s21 = sshll.u32 %s1851_s20, 4  ;;  %s1852_s22 = smov 128   ;;  %s35_s21 = int_to_ptr.vmem [resolvable:$true] %s34_s21 }
   0x4   :  { %s1853_s23 = smov 8  }
   0x5   :  { %40 = dma.hbm_to_vmem [thread:$0]  %s33_s19, 512, %s35_s21, [#allocation3], %s1852_s22, %s1852_s22, %s1853_s23  }
   0x6   :  { %1845 = dma.done.wait [#allocation3], 512  }
   0x7   :  { %1846 = vsyncadd [#allocation3], 4294966784  ;;  %v66_v0 = vld [vmem:[%s2480_s2 + $0x18] sm:$0xff]  ;;  %v65_v2 = vld [vmem:[%s2480_s2 + $0x10] sm:$0xff]  ;;  %vm71_vm0 = vcmask 261120   ;;  %s1854_s17 = smov 64  }
   0x8   :  { %v1932_v1 = vld [vmem:[#allocation2 + $0x18] sm:$0xff]  ;;  %108 = vmatpush.msra.mxu0 %v66_v0  ;;  %v1938_v3 = vld [vmem:[#allocation2 + $0x10] sm:$0xff]  ;;  %v64_v4 = vld [vmem:[%s2480_s2 + $0x8] sm:$0xff]  ;;  %s1855_s20 = smov 96   ;;  %s1856_s21 = smov 32   ;;  %vm239_vm5 = vcmask 523264  }
   0x9   :  { %177 = vmatpush.msra.mxu1 %v1932_v1  ;;  %v1943_v5 = vld [vmem:[#allocation2 + $0x8] sm:$0xff]  ;;  %v63_v6 = vld [vmem:[%s2480_s2] sm:$0xff]  ;;  %v1984_v35 = vld [vmem:[%s2484_s6 + $0x38] sm:$0xff]  ;;  %s1860_s25 = smov [#allocation6]   ;;  %s1541_s27 = sshll.u32 %s2488_s10, 4  ;;  %s1542_s27 = int_to_ptr.hbm [resolvable:$true] %s1541_s27 }
   0xa   :  { %109 = vmatpush.msra.mxu0 %v65_v2  ;;  %v1949_v7 = vld [vmem:[#allocation2] sm:$0xff]  ;;  %v1989_v36 = vld [vmem:[%s2484_s6 + $0x30] sm:$0xff]  ;;  %251 = vmatpush.msra.mxu2 %v1984_v35  ;;  %v1996_v37 = vld [vmem:[%s2484_s6 + $0x28] sm:$0xff]  ;;  %s1549_s26 = sshll.u32 %s1860_s25, 4  ;;  %s1550_s26 = int_to_ptr.vmem [resolvable:$true] %s1549_s26 }
   0xb   :  { %178 = vmatpush.msra.mxu1 %v1938_v3  ;;  %v55_v8 = vld [vmem:[%s2478_s0] sm:$0xff]  ;;  %v1577_v44 = vld [vmem:[%s2479_s1 + $0x8] sm:$0xff]  ;;  %v2023_v47 = vld [vmem:[%s2484_s6 + $0x18] sm:$0xff] }
   0xc   :  { %110 = vmatpush.msra.mxu0 %v64_v4  ;;  %v156_v9 = vld [vmem:[%s2479_s1] sm:$0xff]  ;;  %252 = vmatpush.msra.mxu2 %v1989_v36  ;;  %v56_v45 = vld [vmem:[%s2478_s0 + $0x8] sm:$0xff]  ;;  %v2028_v48 = vld [vmem:[%s2484_s6 + $0x10] sm:$0xff] }
   0xd   :  { %179 = vmatpush.msra.mxu1 %v1943_v5  ;;  %v1968_v10 = vld [vmem:[%s2483_s5] ss:$0 sm:$0xff]  ;;  %v2035_v49 = vld [vmem:[%s2484_s6 + $0x8] sm:$0xff] }
   0xe   :  { %111 = vmatpush.msra.mxu0 %v63_v6  ;;  %v1975_v13 = vld [vmem:[%s2481_s3] ss:$0 sm:$0xff]  ;;  %253 = vmatpush.msra.mxu2 %v1996_v37 }
   0xf   :  { %180 = vmatpush.msra.mxu1 %v1949_v7  ;;  %1569 = vmatmul.msk.f32.vlgmr.msra.gmra.mxu0 %vm71_vm0, %v55_v8  ;;  %v2016_v46 = vld [vmem:[%s2484_s6 + $0x20] sm:$0xff] }
  0x10   :  { %1578 = vmatmul.msk.f32.vlgmr.msra.gmra.mxu1 %vm71_vm0, %v156_v9  ;;  %1075 = vmatpush.msrb.mxu0 %v1984_v35  ;;  %v2044_v50 = vld [vmem:[%s2484_s6] sm:$0xff] }
  0x11   :  { %356 = vmatpush.msrb.mxu1 %v1932_v1  ;;  %254 = vmatpush.msra.mxu2 %v2016_v46  ;;  %v2072_v56 = vld [vmem:[%s2485_s7] ss:$0 sm:$0xff] }
  0x12   :  { %1076 = vmatpush.msrb.mxu0 %v1989_v36 }
  0x13   :  { %357 = vmatpush.msrb.mxu1 %v1938_v3  ;;  %255 = vmatpush.msra.mxu2 %v2023_v47 }
  0x14   :  { %1077 = vmatpush.msrb.mxu0 %v1996_v37 }
  0x15   :  { %358 = vmatpush.msrb.mxu1 %v1943_v5  ;;  %256 = vmatpush.msra.mxu2 %v2028_v48 }
  0x16   :  { %1078 = vmatpush.msrb.mxu0 %v2016_v46 }
  0x17   :  { %359 = vmatpush.msrb.mxu1 %v1949_v7  ;;  %1570 = vmatmul.msk.f32.gmra.mxu0 %vm71_vm0, %v56_v45 }
  0x18   :  { %1079 = vmatpush.msrb.mxu0 %v2023_v47  ;;  %257 = vmatpush.msra.mxu2 %v2035_v49 }
  0x1a   :  { %1080 = vmatpush.msrb.mxu0 %v2028_v48  ;;  %258 = vmatpush.msra.mxu2 %v2044_v50 }
  0x1c   :  { %1081 = vmatpush.msrb.mxu0 %v2035_v49  ;;  %520 = vmatpush.msrb.mxu2 %v1932_v1 }
  0x1e   :  { %1082 = vmatpush.msrb.mxu0 %v2044_v50  ;;  %521 = vmatpush.msrb.mxu2 %v1938_v3 }
  0x20   :  { %1403 = vmatpush.msra.mxu0 %v1984_v35  ;;  %522 = vmatpush.msrb.mxu2 %v1943_v5 }
  0x22   :  { %1404 = vmatpush.msra.mxu0 %v1989_v36  ;;  %523 = vmatpush.msrb.mxu2 %v1949_v7 }
  0x24   :  { %1405 = vmatpush.msra.mxu0 %v1996_v37 }
  0x26   :  { %1406 = vmatpush.msra.mxu0 %v2016_v46 }
  0x28   :  { %1407 = vmatpush.msra.mxu0 %v2023_v47 }
  0x2a   :  { %1408 = vmatpush.msra.mxu0 %v2028_v48 }
  0x2c   :  { %1409 = vmatpush.msra.mxu0 %v2035_v49 }
  0x2e   :  { %1410 = vmatpush.msra.mxu0 %v2044_v50 }
  0x8c   :  { %v113_v14 = vpop.f32.mrf.mxu0 }
  0x8d   :  { %v182_v11 = vpop.f32.mrf.mxu1  ;;  %v114_v15 = vadd.f32 %v1975_v13, %v113_v14 }
  0x8e   :  { %v183_v12 = vadd.f32 %v1968_v10, %v182_v11 }
  0x90   :  { %206 = vrot.lane.b32.xlu0 %v183_v12, %s1854_s17  ;;  %v185_v16 = vadd.f32 %v183_v12, %v114_v15 }
  0x92   :  { %v1579_v17 = vmul.f32 -1.442695, %v185_v16 }
  0x94   :  { %1634 = vpow2.f32 %v1579_v17  ;;  %v116_v59 = vpop.f32.mrf.mxu0 }
  0x95   :  { %v117_v60 = vadd.f32 %v1975_v13, %v116_v59 }
  0x9a   :  { %v1635_v18 = vpop.eup %1634 }
  0x9b   :  { %v189_v19 = vadd.f32 1.0, %v1635_v18 }
  0x9d   :  { %1636 = vrcp.f32 %v189_v19  ;;  %v201_v25 = vand.u32 2147483648, %v189_v19  ;;  %vm195_vm2 = vweird.f32 %v189_v19  ;;  %v199_v26 = vand.u32 2147483647, %v189_v19 }
  0x9f   :  { %v202_v28 = vor.u32 1.1754944e-38, %v201_v25  ;;  %vm200_vm4 = vcmp.eq.f32.partialorder %v199_v26, 8.507059e+37 }
  0xa3   :  { %v1637_v20 = vpop.eup %1636 }
  0xa4   :  { %v191_v21 = vmul.f32 %v1637_v20, %v189_v19  ;;  %vm196_vm1 = vweird.f32 %v1637_v20 }
  0xa5   :  { %vm197_vm3 = vmor %vm195_vm2, %vm196_vm1 }
  0xa6   :  { %v192_v22 = vsub.f32 1.0, %v191_v21 }
  0xa8   :  { %v193_v23 = vmul.f32 %v1637_v20, %v192_v22 }
  0xaa   :  { %v194_v24 = vadd.f32 %v1637_v20, %v193_v23 }
  0xac   :  { %v198_v27 = vsel %vm197_vm3, %v1637_v20, %v194_v24 }
  0xad   :  { %v203_v30 = vsel %vm200_vm4, %v202_v28, %v198_v27 }
  0xae   :  { %v216_v39 = vsub.f32 1.0, %v203_v30 }
 0x102   :  { %v207_v29 = vpop.permute.xlu0 %206 }
 0x103   :  { %v209_v31 = vmul.f32 %v207_v29, %v203_v30 }
 0x105   :  { %211 = vrot.lane.b32.xlu0 %v209_v31, %s1854_s17 }
 0x177   :  { %v212_v32 = vpop.permute.xlu0 %211 }
 0x178   :  { %v214_v33 = vadd.f32 %v212_v32, %v114_v15 }
 0x17a   :  { %1638 = vtanh.f32 %v214_v33 }
 0x180   :  { %v1639_v34 = vpop.eup %1638 }
 0x181   :  { %218 = vrot.lane.b32.xlu1 %v1639_v34, %s1855_s20 }
 0x189   :  { %222 = vrot.lane.b32.xlu1 %v156_v9, %s1856_s21 }
 0x1f3   :  { %v219_v38 = vpop.permute.xlu1 %218 }
 0x1f4   :  { %v221_v41 = vmul.f32 %v219_v38, %v216_v39 }
 0x1fb   :  { %v223_v40 = vpop.permute.xlu1 %222 }
 0x1fc   :  { %v225_v42 = vmul.f32 %v223_v40, %v203_v30 }
 0x1fe   :  { %v2002_v43 = vadd.f32 %v225_v42, %v221_v41 }
 0x200   :  { %228 = vrot.lane.b32.xlu2 %v2002_v43, %s1855_s20 }
 0x208   :  { %232 = vrot.lane.b32.xlu2 %v1577_v44, %s1856_s21 }
 0x25a   :  { %v229_v51 = vpop.permute.xlu2 %228 }
 0x25b   :  { %1583 = vmatmul.msk.f32.vlgmr.msrb.gmra.mxu1 %vm71_vm0, %v229_v51 }
 0x262   :  { %v2062_v52 = vpop.permute.xlu2 %232 }
 0x263   :  { %v235_v53 = vsel %vm71_vm0, %v229_v51, %v2062_v52 }
 0x264   :  { %1580 = vmatmul.msk.f32.vlgmr.msra.gmra.mxu2 %vm239_vm5, %v235_v53 }
 0x2d8   :  { %v361_v54 = vpop.f32.mrf.mxu1 }
 0x2d9   :  { %v362_v55 = vadd.f32 %v1968_v10, %v361_v54 }
 0x2db   :  { %385 = vrot.lane.b32.xlu0 %v362_v55, %s1854_s17  ;;  %v364_v61 = vadd.f32 %v362_v55, %v117_v60 }
 0x2dd   :  { %v1584_v62 = vmul.f32 -1.442695, %v364_v61  ;;  %v2097_v61 = vld [vmem:[%s2486_s8 + $0x18] sm:$0xff] }
 0x2de   :  { %321 = vmatpush.msra.mxu3 %v2097_v61  ;;  %486 = vmatpush.msra.mxu1 %v2097_v61 }
 0x2df   :  { %1640 = vpow2.f32 %v1584_v62  ;;  %v2102_v62 = vld [vmem:[%s2486_s8 + $0x10] sm:$0xff]  ;;  %650 = vmatpush.msra.mxu2 %v2097_v61 }
 0x2e0   :  { %322 = vmatpush.msra.mxu3 %v2102_v62  ;;  %487 = vmatpush.msra.mxu1 %v2102_v62 }
 0x2e1   :  { %651 = vmatpush.msra.mxu2 %v2102_v62 }
 0x2e5   :  { %v1641_v0 = vpop.eup %1640 }
 0x2e6   :  { %v368_v2 = vadd.f32 1.0, %v1641_v0 }
 0x2e7   :  { %v260_v57 = vpop.f32.mrf.mxu2 }
 0x2e8   :  { %v261_v58 = vadd.f32 %v2072_v56, %v260_v57  ;;  %v380_v18 = vand.u32 2147483648, %v368_v2  ;;  %vm374_vm7 = vweird.f32 %v368_v2  ;;  %v378_v19 = vand.u32 2147483647, %v368_v2 }
 0x2ea   :  { %283 = vrot.lane.b32.xlu2 %v261_v58, %s1856_s21  ;;  %v1581_v63 = vmul.f32 -1.442695, %v261_v58  ;;  %v381_v22 = vor.u32 1.1754944e-38, %v380_v18  ;;  %vm379_vm9 = vcmp.eq.f32.partialorder %v378_v19, 8.507059e+37 }
 0x2ec   :  { %1642 = vpow2.f32 %v1581_v63  ;;  %v2117_v63 = vld [vmem:[%s2486_s8] sm:$0xff] }
 0x2ed   :  { %1644 = vrcp.f32 %v368_v2 }
 0x2f2   :  { %v1643_v4 = vpop.eup %1642 }
 0x2f3   :  { %v266_v6 = vadd.f32 1.0, %v1643_v4  ;;  %v1645_v8 = vpop.eup %1644 }
 0x2f4   :  { %v370_v9 = vmul.f32 %v1645_v8, %v368_v2  ;;  %vm375_vm6 = vweird.f32 %v1645_v8 }
 0x2f5   :  { %1646 = vrcp.f32 %v266_v6  ;;  %vm376_vm8 = vmor %vm374_vm7, %vm375_vm6  ;;  %v278_v27 = vand.u32 2147483648, %v266_v6  ;;  %vm272_vm11 = vweird.f32 %v266_v6  ;;  %v276_v28 = vand.u32 2147483647, %v266_v6 }
 0x2f6   :  { %v371_v11 = vsub.f32 1.0, %v370_v9 }
 0x2f7   :  { %v279_v31 = vor.u32 1.1754944e-38, %v278_v27  ;;  %vm277_vm13 = vcmp.eq.f32.partialorder %v276_v28, 8.507059e+37 }
 0x2f8   :  { %v372_v15 = vmul.f32 %v1645_v8, %v371_v11 }
 0x2fa   :  { %v373_v17 = vadd.f32 %v1645_v8, %v372_v15 }
 0x2fb   :  { %v1647_v12 = vpop.eup %1646 }
 0x2fc   :  { %v268_v14 = vmul.f32 %v1647_v12, %v266_v6  ;;  %v377_v21 = vsel %vm376_vm8, %v1645_v8, %v373_v17  ;;  %vm273_vm10 = vweird.f32 %v1647_v12 }
 0x2fd   :  { %v382_v24 = vsel %vm379_vm9, %v381_v22, %v377_v21  ;;  %vm274_vm12 = vmor %vm272_vm11, %vm273_vm10 }
 0x2fe   :  { %v269_v16 = vsub.f32 1.0, %v268_v14  ;;  %v395_v44 = vsub.f32 1.0, %v382_v24  ;;  %v401_v51 = vmul.f32 %v382_v24, %v2002_v43  ;;  %v57_v43 = vld [vmem:[%s2478_s0 + $0x10] sm:$0xff] }
 0x2ff   :  { %1571 = vmatmul.msk.f32.gmra.mxu0 %vm71_vm0, %v57_v43 }
 0x300   :  { %v270_v20 = vmul.f32 %v1647_v12, %v269_v16 }
 0x302   :  { %v271_v25 = vadd.f32 %v1647_v12, %v270_v20 }
 0x304   :  { %v275_v29 = vsel %vm274_vm12, %v1647_v12, %v271_v25 }
 0x305   :  { %v280_v32 = vsel %vm277_vm13, %v279_v31, %v275_v29 }
 0x306   :  { %v293_v55 = vsub.f32 1.0, %v280_v32 }
 0x344   :  { %v284_v30 = vpop.permute.xlu2 %283 }
 0x345   :  { %v286_v33 = vmul.f32 %v284_v30, %v280_v32 }
 0x34d   :  { %v386_v23 = vpop.permute.xlu0 %385 }
 0x34e   :  { %v388_v26 = vmul.f32 %v386_v23, %v382_v24 }
 0x350   :  { %390 = vrot.lane.b32.xlu1 %v388_v26, %s1854_s17 }
 0x358   :  { %288 = vrot.lane.b32.xlu1 %v286_v33, %s1854_s17 }
 0x37c   :  { %v119_v11 = vpop.f32.mrf.mxu0 }
 0x37d   :  { %v120_v12 = vadd.f32 %v1975_v13, %v119_v11 }
 0x3c2   :  { %v391_v34 = vpop.permute.xlu1 %390 }
 0x3c3   :  { %v393_v38 = vadd.f32 %v391_v34, %v117_v60 }
 0x3c5   :  { %1648 = vtanh.f32 %v393_v38 }
 0x3ca   :  { %v289_v39 = vpop.permute.xlu1 %288 }
 0x3cb   :  { %v1649_v40 = vpop.eup %1648  ;;  %v291_v41 = vadd.f32 %v289_v39, %v261_v58  ;;  %v299_v58 = vmul.f32 %v280_v32, %v2062_v52  ;;  %v2109_v52 = vld [vmem:[%s2486_s8 + $0x8] sm:$0xff] }
 0x3cc   :  { %397 = vrot.lane.b32.xlu0 %v1649_v40, %s1855_s20  ;;  %323 = vmatpush.msra.mxu3 %v2109_v52 }
 0x3cd   :  { %1650 = vtanh.f32 %v291_v41  ;;  %488 = vmatpush.msra.mxu1 %v2109_v52  ;;  %652 = vmatpush.msra.mxu2 %v2109_v52 }
 0x3ce   :  { %324 = vmatpush.msra.mxu3 %v2117_v63 }
 0x3cf   :  { %489 = vmatpush.msra.mxu1 %v2117_v63  ;;  %653 = vmatpush.msra.mxu2 %v2117_v63 }
 0x3d0   :  { %419 = vmatpush.msrb.mxu3 %v1984_v35 }
 0x3d1   :  { %583 = vmatpush.msrb.mxu1 %v1984_v35 }
 0x3d2   :  { %420 = vmatpush.msrb.mxu3 %v1989_v36 }
 0x3d3   :  { %v1651_v42 = vpop.eup %1650  ;;  %584 = vmatpush.msrb.mxu1 %v1989_v36 }
 0x3d4   :  { %295 = vrot.lane.b32.xlu0 %v1651_v42, %s1855_s20  ;;  %421 = vmatpush.msrb.mxu3 %v1996_v37 }
 0x3d5   :  { %585 = vmatpush.msrb.mxu1 %v1996_v37 }
 0x3d6   :  { %422 = vmatpush.msrb.mxu3 %v2016_v46 }
 0x3d7   :  { %586 = vmatpush.msrb.mxu1 %v2016_v46 }
 0x3d8   :  { %423 = vmatpush.msrb.mxu3 %v2023_v47 }
 0x3d9   :  { %587 = vmatpush.msrb.mxu1 %v2023_v47 }
 0x3da   :  { %424 = vmatpush.msrb.mxu3 %v2028_v48 }
 0x3db   :  { %588 = vmatpush.msrb.mxu1 %v2028_v48 }
 0x3dc   :  { %425 = vmatpush.msrb.mxu3 %v2035_v49 }
 0x3dd   :  { %589 = vmatpush.msrb.mxu1 %v2035_v49 }
 0x3de   :  { %426 = vmatpush.msrb.mxu3 %v2044_v50 }
 0x3df   :  { %590 = vmatpush.msrb.mxu1 %v2044_v50 }
 0x43e   :  { %v398_v45 = vpop.permute.xlu0 %397 }
 0x43f   :  { %v400_v53 = vmul.f32 %v398_v45, %v395_v44 }
 0x441   :  { %v2082_v54 = vadd.f32 %v401_v51, %v400_v53 }
 0x443   :  { %404 = vrot.lane.b32.xlu2 %v2082_v54, %s1855_s20 }
 0x446   :  { %v296_v57 = vpop.permute.xlu0 %295 }
 0x447   :  { %v298_v59 = vmul.f32 %v296_v57, %v293_v55 }
 0x449   :  { %v2087_v60 = vadd.f32 %v299_v58, %v298_v59 }
 0x44b   :  { %305 = vrot.lane.b32.xlu1 %v2087_v60, %s1855_s20 }
 0x49d   :  { %v405_v0 = vpop.permute.xlu2 %404 }
 0x49e   :  { %1588 = vmatmul.msk.f32.vlgmr.msrb.gmra.mxu2 %vm71_vm0, %v405_v0  ;;  %v407_v4 = vsel %vm71_vm0, %v405_v0, %v2087_v60 }
 0x49f   :  { %747 = vmatpush.msrb.mxu2 %v1984_v35 }
 0x4a1   :  { %748 = vmatpush.msrb.mxu2 %v1989_v36 }
 0x4a3   :  { %749 = vmatpush.msrb.mxu2 %v1996_v37 }
 0x4a5   :  { %750 = vmatpush.msrb.mxu2 %v2016_v46 }
 0x4a7   :  { %751 = vmatpush.msrb.mxu2 %v2023_v47 }
 0x4a9   :  { %752 = vmatpush.msrb.mxu2 %v2028_v48 }
 0x4ab   :  { %753 = vmatpush.msrb.mxu2 %v2035_v49 }
 0x4ad   :  { %754 = vmatpush.msrb.mxu2 %v2044_v50 }
 0x4bd   :  { %v306_v2 = vpop.permute.xlu1 %305 }
 0x4be   :  { %1582 = vmatmul.msk.f32.vlgmr.msra.gmra.mxu3 %vm71_vm0, %v306_v2 }
 0x4bf   :  { %684 = vmatpush.msra.mxu3 %v1932_v1 }
 0x4c1   :  { %685 = vmatpush.msra.mxu3 %v1938_v3 }
 0x4c3   :  { %686 = vmatpush.msra.mxu3 %v1943_v5 }
 0x4c5   :  { %687 = vmatpush.msra.mxu3 %v1949_v7 }
 0x4c6   :  { %1585 = vmatmul.msk.f32.vlgmr.msrb.gmra.mxu3 %vm239_vm5, %v407_v4 }
 0x4c7   :  { %814 = vmatpush.msrb.mxu3 %v2097_v61 }
 0x4c9   :  { %815 = vmatpush.msrb.mxu3 %v2102_v62 }
 0x4cb   :  { %816 = vmatpush.msrb.mxu3 %v2109_v52 }
 0x4cd   :  { %817 = vmatpush.msrb.mxu3 %v2117_v63 }
 0x521   :  { %v525_v6 = vpop.f32.mrf.mxu2 }
 0x522   :  { %v526_v8 = vadd.f32 %v1968_v10, %v525_v6 }
 0x524   :  { %549 = vrot.lane.b32.xlu2 %v526_v8, %s1854_s17  ;;  %v528_v16 = vadd.f32 %v526_v8, %v120_v12 }
 0x526   :  { %v1589_v17 = vmul.f32 -1.442695, %v528_v16 }
 0x528   :  { %1652 = vpow2.f32 %v1589_v17  ;;  %v58_v17 = vld [vmem:[%s2478_s0 + $0x18] sm:$0xff] }
 0x529   :  { %1572 = vmatmul.msk.f32.gmra.mxu0 %vm71_vm0, %v58_v17 }
 0x52e   :  { %v1653_v18 = vpop.eup %1652 }
 0x52f   :  { %v532_v19 = vadd.f32 1.0, %v1653_v18 }
 0x531   :  { %1654 = vrcp.f32 %v532_v19  ;;  %v544_v25 = vand.u32 2147483648, %v532_v19  ;;  %vm538_vm15 = vweird.f32 %v532_v19  ;;  %v542_v26 = vand.u32 2147483647, %v532_v19 }
 0x533   :  { %v545_v28 = vor.u32 1.1754944e-38, %v544_v25  ;;  %vm543_vm2 = vcmp.eq.f32.partialorder %v542_v26, 8.507059e+37 }
 0x537   :  { %v1655_v20 = vpop.eup %1654 }
 0x538   :  { %v534_v21 = vmul.f32 %v1655_v20, %v532_v19  ;;  %vm539_vm14 = vweird.f32 %v1655_v20 }
 0x539   :  { %vm540_vm1 = vmor %vm538_vm15, %vm539_vm14 }
 0x53a   :  { %v535_v22 = vsub.f32 1.0, %v534_v21 }
 0x53c   :  { %v536_v23 = vmul.f32 %v1655_v20, %v535_v22 }
 0x53e   :  { %v537_v24 = vadd.f32 %v1655_v20, %v536_v23 }
 0x540   :  { %v541_v27 = vsel %vm540_vm1, %v1655_v20, %v537_v24 }
 0x541   :  { %v2166_v9 = vpop.f32.mrf.mxu3  ;;  %v546_v30 = vsel %vm543_vm2, %v545_v28, %v541_v27 }
 0x542   :  { %v559_v2 = vsub.f32 1.0, %v546_v30  ;;  %v565_v6 = vmul.f32 %v546_v30, %v2082_v54 }
 0x549   :  { %v428_v14 = vpop.f32.mrf.mxu3 }
 0x54a   :  { %v429_v15 = vadd.f32 %v2072_v56, %v428_v14 }
 0x54c   :  { %451 = vrot.lane.b32.xlu2 %v429_v15, %s1856_s21  ;;  %v1586_v32 = vmul.f32 -1.442695, %v429_v15 }
 0x54e   :  { %1656 = vpow2.f32 %v1586_v32 }
 0x554   :  { %v1657_v33 = vpop.eup %1656 }
 0x555   :  { %v434_v34 = vadd.f32 1.0, %v1657_v33 }
 0x557   :  { %1658 = vrcp.f32 %v434_v34  ;;  %v446_v53 = vand.u32 2147483648, %v434_v34  ;;  %vm440_vm4 = vweird.f32 %v434_v34  ;;  %v444_v55 = vand.u32 2147483647, %v434_v34 }
 0x559   :  { %v447_v59 = vor.u32 1.1754944e-38, %v446_v53  ;;  %vm445_vm7 = vcmp.eq.f32.partialorder %v444_v55, 8.507059e+37 }
 0x55d   :  { %v1659_v38 = vpop.eup %1658 }
 0x55e   :  { %v436_v39 = vmul.f32 %v1659_v38, %v434_v34  ;;  %vm441_vm3 = vweird.f32 %v1659_v38 }
 0x55f   :  { %vm442_vm6 = vmor %vm440_vm4, %vm441_vm3 }
 0x560   :  { %v437_v40 = vsub.f32 1.0, %v436_v39 }
 0x562   :  { %v438_v44 = vmul.f32 %v1659_v38, %v437_v40 }
 0x564   :  { %v439_v45 = vadd.f32 %v1659_v38, %v438_v44 }
 0x566   :  { %v443_v57 = vsel %vm442_vm6, %v1659_v38, %v439_v45 }
 0x567   :  { %v448_v43 = vsel %vm445_vm7, %v447_v59, %v443_v57 }
 0x568   :  { %v461_v18 = vsub.f32 1.0, %v448_v43  ;;  %v467_v19 = vmul.f32 %v448_v43, %v2087_v60 }
 0x57e   :  { %v550_v29 = vpop.permute.xlu2 %549 }
 0x57f   :  { %v552_v31 = vmul.f32 %v550_v29, %v546_v30 }
 0x581   :  { %554 = vrot.lane.b32.xlu0 %v552_v31, %s1854_s17 }
 0x5a6   :  { %v452_v58 = vpop.permute.xlu2 %451  ;;  %v122_v25 = vpop.f32.mrf.mxu0 }
 0x5a7   :  { %v454_v0 = vmul.f32 %v452_v58, %v448_v43  ;;  %v123_v26 = vadd.f32 %v1975_v13, %v122_v25 }
 0x5f3   :  { %v555_v41 = vpop.permute.xlu0 %554 }
 0x5f4   :  { %v557_v42 = vadd.f32 %v555_v41, %v120_v12 }
 0x5f6   :  { %1660 = vtanh.f32 %v557_v42 }
 0x5fc   :  { %v1661_v51 = vpop.eup %1660 }
 0x5fd   :  { %561 = vrot.lane.b32.xlu1 %v1661_v51, %s1855_s20 }
 0x605   :  { %456 = vrot.lane.b32.xlu1 %v454_v0, %s1854_s17 }
 0x66f   :  { %v562_v4 = vpop.permute.xlu1 %561 }
 0x670   :  { %v564_v8 = vmul.f32 %v562_v4, %v559_v2 }
 0x672   :  { %v2175_v11 = vadd.f32 %v565_v6, %v564_v8 }
 0x674   :  { %568 = vrot.lane.b32.xlu0 %v2175_v11, %s1855_s20 }
 0x677   :  { %v457_v12 = vpop.permute.xlu1 %456 }
 0x678   :  { %v459_v14 = vadd.f32 %v457_v12, %v429_v15 }
 0x67a   :  { %1662 = vtanh.f32 %v459_v14 }
 0x680   :  { %v1663_v16 = vpop.eup %1662 }
 0x681   :  { %463 = vrot.lane.b32.xlu2 %v1663_v16, %s1855_s20 }
 0x6db   :  { %v464_v54 = vpop.permute.xlu2 %463 }
 0x6dc   :  { %v466_v20 = vmul.f32 %v464_v54, %v461_v18 }
 0x6de   :  { %v2185_v21 = vadd.f32 %v467_v19, %v466_v20 }
 0x6e0   :  { %470 = vrot.lane.b32.xlu0 %v2185_v21, %s1855_s20 }
 0x6e6   :  { %v569_v15 = vpop.permute.xlu0 %568 }
 0x6e7   :  { %1593 = vmatmul.msk.f32.vlgmr.msra.gmra.mxu3 %vm71_vm0, %v569_v15  ;;  %v571_v22 = vsel %vm71_vm0, %v569_v15, %v2185_v21 }
 0x6e8   :  { %911 = vmatpush.msra.mxu3 %v1984_v35 }
 0x6ea   :  { %912 = vmatpush.msra.mxu3 %v1989_v36 }
 0x6ec   :  { %913 = vmatpush.msra.mxu3 %v1996_v37 }
 0x6ee   :  { %914 = vmatpush.msra.mxu3 %v2016_v46 }
 0x6f0   :  { %915 = vmatpush.msra.mxu3 %v2023_v47 }
 0x6f2   :  { %916 = vmatpush.msra.mxu3 %v2028_v48 }
 0x6f4   :  { %917 = vmatpush.msra.mxu3 %v2035_v49 }
 0x6f6   :  { %918 = vmatpush.msra.mxu3 %v2044_v50 }
 0x752   :  { %v471_v60 = vpop.permute.xlu0 %470 }
 0x753   :  { %1587 = vmatmul.msk.f32.vlgmr.msra.gmra.mxu1 %vm71_vm0, %v471_v60 }
 0x754   :  { %848 = vmatpush.msra.mxu1 %v1932_v1 }
 0x756   :  { %849 = vmatpush.msra.mxu1 %v1938_v3 }
 0x758   :  { %850 = vmatpush.msra.mxu1 %v1943_v5 }
 0x75a   :  { %851 = vmatpush.msra.mxu1 %v1949_v7 }
 0x75b   :  { %1590 = vmatmul.msk.f32.vlgmr.msrb.gmra.mxu1 %vm239_vm5, %v571_v22 }
 0x75c   :  { %978 = vmatpush.msrb.mxu1 %v2097_v61 }
 0x75e   :  { %979 = vmatpush.msrb.mxu1 %v2102_v62 }
 0x760   :  { %980 = vmatpush.msrb.mxu1 %v2109_v52 }
 0x762   :  { %981 = vmatpush.msrb.mxu1 %v2117_v63 }
 0x76a   :  { %v689_v23 = vpop.f32.mrf.mxu3 }
 0x76b   :  { %v690_v24 = vadd.f32 %v1968_v10, %v689_v23 }
 0x76d   :  { %713 = vrot.lane.b32.xlu1 %v690_v24, %s1854_s17  ;;  %v692_v27 = vadd.f32 %v690_v24, %v123_v26 }
 0x76f   :  { %v1594_v28 = vmul.f32 -1.442695, %v692_v27 }
 0x771   :  { %1664 = vpow2.f32 %v1594_v28 }
 0x777   :  { %v1665_v29 = vpop.eup %1664 }
 0x778   :  { %v696_v30 = vadd.f32 1.0, %v1665_v29 }
 0x77a   :  { %1666 = vrcp.f32 %v696_v30  ;;  %v708_v42 = vand.u32 2147483648, %v696_v30  ;;  %vm702_vm9 = vweird.f32 %v696_v30  ;;  %v706_v44 = vand.u32 2147483647, %v696_v30 }
 0x77c   :  { %v709_v51 = vor.u32 1.1754944e-38, %v708_v42  ;;  %vm707_vm11 = vcmp.eq.f32.partialorder %v706_v44, 8.507059e+37 }
 0x780   :  { %v1667_v31 = vpop.eup %1666 }
 0x781   :  { %v698_v32 = vmul.f32 %v1667_v31, %v696_v30  ;;  %vm703_vm8 = vweird.f32 %v1667_v31  ;;  %v59_v30 = vld [vmem:[%s2478_s0 + $0x20] sm:$0xff] }
 0x782   :  { %vm704_vm10 = vmor %vm702_vm9, %vm703_vm8  ;;  %1573 = vmatmul.msk.f32.gmra.mxu0 %vm71_vm0, %v59_v30 }
 0x783   :  { %v699_v34 = vsub.f32 1.0, %v698_v32 }
 0x785   :  { %v700_v38 = vmul.f32 %v1667_v31, %v699_v34 }
 0x787   :  { %v701_v40 = vadd.f32 %v1667_v31, %v700_v38 }
 0x789   :  { %v705_v45 = vsel %vm704_vm10, %v1667_v31, %v701_v40 }
 0x78a   :  { %v710_v53 = vsel %vm707_vm11, %v709_v51, %v705_v45 }
 0x78b   :  { %v723_v22 = vsub.f32 1.0, %v710_v53  ;;  %v729_v24 = vmul.f32 %v710_v53, %v2175_v11 }
 0x7d0   :  { %v2213_v33 = vpop.f32.mrf.mxu1 }
 0x7d8   :  { %v592_v39 = vpop.f32.mrf.mxu1 }
 0x7d9   :  { %v593_v41 = vadd.f32 %v2072_v56, %v592_v39 }
 0x7db   :  { %615 = vrot.lane.b32.xlu1 %v593_v41, %s1856_s21  ;;  %v1591_v58 = vmul.f32 -1.442695, %v593_v41 }
 0x7dd   :  { %1668 = vpow2.f32 %v1591_v58 }
 0x7df   :  { %v714_v55 = vpop.permute.xlu1 %713 }
 0x7e0   :  { %v716_v57 = vmul.f32 %v714_v55, %v710_v53 }
 0x7e2   :  { %718 = vrot.lane.b32.xlu2 %v716_v57, %s1854_s17 }
 0x7e3   :  { %v1669_v59 = vpop.eup %1668 }
 0x7e4   :  { %v598_v43 = vadd.f32 1.0, %v1669_v59 }
 0x7e6   :  { %1670 = vrcp.f32 %v598_v43  ;;  %v610_v17 = vand.u32 2147483648, %v598_v43  ;;  %vm604_vm13 = vweird.f32 %v598_v43  ;;  %v608_v18 = vand.u32 2147483647, %v598_v43 }
 0x7e8   :  { %v611_v19 = vor.u32 1.1754944e-38, %v610_v17  ;;  %vm609_vm15 = vcmp.eq.f32.partialorder %v608_v18, 8.507059e+37 }
 0x7ec   :  { %v1671_v0 = vpop.eup %1670 }
 0x7ed   :  { %v600_v2 = vmul.f32 %v1671_v0, %v598_v43  ;;  %vm605_vm12 = vweird.f32 %v1671_v0 }
 0x7ee   :  { %vm606_vm14 = vmor %vm604_vm13, %vm605_vm12 }
 0x7ef   :  { %v601_v8 = vsub.f32 1.0, %v600_v2 }
 0x7f1   :  { %v602_v12 = vmul.f32 %v1671_v0, %v601_v8 }
 0x7f3   :  { %v603_v16 = vadd.f32 %v1671_v0, %v602_v12 }
 0x7f5   :  { %v607_v54 = vsel %vm606_vm14, %v1671_v0, %v603_v16 }
 0x7f6   :  { %v612_v20 = vsel %vm609_vm15, %v611_v19, %v607_v54 }
 0x7f7   :  { %v625_v11 = vsub.f32 1.0, %v612_v20  ;;  %v631_v34 = vmul.f32 %v612_v20, %v2185_v21 }
 0x83c   :  { %v719_v4 = vpop.permute.xlu2 %718 }
 0x83d   :  { %v721_v6 = vadd.f32 %v719_v4, %v123_v26 }
 0x83f   :  { %1672 = vtanh.f32 %v721_v6 }
 0x845   :  { %v1673_v14 = vpop.eup %1672 }
 0x846   :  { %725 = vrot.lane.b32.xlu0 %v1673_v14, %s1855_s20 }
 0x84d   :  { %v616_v15 = vpop.permute.xlu1 %615 }
 0x84e   :  { %v618_v60 = vmul.f32 %v616_v15, %v612_v20 }
 0x850   :  { %620 = vrot.lane.b32.xlu0 %v618_v60, %s1854_s17 }
 0x8b8   :  { %v726_v23 = vpop.permute.xlu0 %725 }
 0x8b9   :  { %v728_v25 = vmul.f32 %v726_v23, %v723_v22 }
 0x8bb   :  { %v2221_v26 = vadd.f32 %v729_v24, %v728_v25 }
 0x8bd   :  { %732 = vrot.lane.b32.xlu2 %v2221_v26, %s1855_s20 }
 0x8c2   :  { %v621_v27 = vpop.permute.xlu0 %620 }
 0x8c3   :  { %v623_v28 = vadd.f32 %v621_v27, %v593_v41 }
 0x8c5   :  { %1674 = vtanh.f32 %v623_v28 }
 0x8cb   :  { %v1675_v29 = vpop.eup %1674 }
 0x8cc   :  { %627 = vrot.lane.b32.xlu1 %v1675_v29, %s1855_s20 }
 0x917   :  { %v733_v31 = vpop.permute.xlu2 %732 }
 0x918   :  { %1598 = vmatmul.msk.f32.vlgmr.msra.gmra.mxu1 %vm71_vm0, %v733_v31 }
 0x919   :  { %1142 = vmatpush.msra.mxu1 %v2097_v61 }
 0x91b   :  { %1143 = vmatpush.msra.mxu1 %v2102_v62 }
 0x91d   :  { %1144 = vmatpush.msra.mxu1 %v2109_v52  ;;  %v125_v52 = vpop.f32.mrf.mxu0 }
 0x91f   :  { %1145 = vmatpush.msra.mxu1 %v2117_v63  ;;  %v126_v63 = vadd.f32 %v1975_v13, %v125_v52  ;;  %v1764_v52 = vld [vmem:[#allocation2 + $0x8] sm:$0xff] }
 0x93e   :  { %v628_v32 = vpop.permute.xlu1 %627 }
 0x93f   :  { %v630_v38 = vmul.f32 %v628_v32, %v625_v11 }
 0x941   :  { %v2236_v39 = vadd.f32 %v631_v34, %v630_v38 }
 0x943   :  { %634 = vrot.lane.b32.xlu2 %v2236_v39, %s1855_s20  ;;  %v735_v62 = vsel %vm71_vm0, %v733_v31, %v2236_v39 }
 0x995   :  { %v853_v40 = vpop.f32.mrf.mxu1 }
 0x996   :  { %v854_v41 = vadd.f32 %v1968_v10, %v853_v40 }
 0x998   :  { %877 = vrot.lane.b32.xlu0 %v854_v41, %s1854_s17  ;;  %v856_v21 = vadd.f32 %v854_v41, %v126_v63  ;;  %v60_v41 = vld [vmem:[%s2478_s0 + $0x28] sm:$0xff] }
 0x999   :  { %1574 = vmatmul.msk.f32.gmra.mxu0 %vm71_vm0, %v60_v41 }
 0x99a   :  { %v1599_v42 = vmul.f32 -1.442695, %v856_v21 }
 0x99c   :  { %1676 = vpow2.f32 %v1599_v42 }
 0x99d   :  { %v635_v61 = vpop.permute.xlu2 %634 }
 0x99e   :  { %1592 = vmatmul.msk.f32.vlgmr.msra.gmra.mxu2 %vm71_vm0, %v635_v61 }
 0x99f   :  { %1012 = vmatpush.msra.mxu2 %v1932_v1 }
 0x9a1   :  { %1013 = vmatpush.msra.mxu2 %v1938_v3 }
 0x9a2   :  { %v1677_v44 = vpop.eup %1676 }
 0x9a3   :  { %1014 = vmatpush.msra.mxu2 %v1943_v5  ;;  %v860_v45 = vadd.f32 1.0, %v1677_v44 }
 0x9a5   :  { %1015 = vmatpush.msra.mxu2 %v1949_v7  ;;  %1678 = vrcp.f32 %v860_v45  ;;  %vm866_vm2 = vweird.f32 %v860_v45 }
 0x9a6   :  { %1595 = vmatmul.msk.f32.vlgmr.msrb.gmra.mxu2 %vm239_vm5, %v735_v62  ;;  %v1763_v62 = vld [vmem:[#allocation2 + $0x10] sm:$0xff] }
 0x9a7   :  { %1176 = vmatpush.msrb.mxu2 %v1932_v1 }
 0x9a9   :  { %1177 = vmatpush.msrb.mxu2 %v1938_v3  ;;  %v872_v3 = vand.u32 2147483648, %v860_v45 }
 0x9ab   :  { %1178 = vmatpush.msrb.mxu2 %v1943_v5  ;;  %v1679_v51 = vpop.eup %1678  ;;  %v870_v5 = vand.u32 2147483647, %v860_v45  ;;  %v873_v58 = vor.u32 1.1754944e-38, %v872_v3 }
 0x9ac   :  { %v862_v53 = vmul.f32 %v1679_v51, %v860_v45  ;;  %vm867_vm1 = vweird.f32 %v1679_v51 }
 0x9ad   :  { %1179 = vmatpush.msrb.mxu2 %v1949_v7  ;;  %vm868_vm3 = vmor %vm866_vm2, %vm867_vm1  ;;  %vm871_vm4 = vcmp.eq.f32.partialorder %v870_v5, 8.507059e+37 }
 0x9ae   :  { %v863_v55 = vsub.f32 1.0, %v862_v53 }
 0x9b0   :  { %v864_v57 = vmul.f32 %v1679_v51, %v863_v55 }
 0x9b2   :  { %v865_v1 = vadd.f32 %v1679_v51, %v864_v57 }
 0x9b4   :  { %v869_v7 = vsel %vm868_vm3, %v1679_v51, %v865_v1 }
 0x9b5   :  { %v874_v13 = vsel %vm871_vm4, %v873_v58, %v869_v7 }
 0x9b6   :  { %v887_v29 = vsub.f32 1.0, %v874_v13  ;;  %v893_v31 = vmul.f32 %v874_v13, %v2221_v26  ;;  %v1762_v26 = vld [vmem:[#allocation2 + $0x18] sm:$0xff] }
 0xa0a   :  { %v878_v59 = vpop.permute.xlu0 %877 }
 0xa0b   :  { %v880_v43 = vmul.f32 %v878_v59, %v874_v13 }
 0xa0d   :  { %882 = vrot.lane.b32.xlu1 %v880_v43, %s1854_s17 }
 0xa21   :  { %v2256_v0 = vpop.f32.mrf.mxu2 }
 0xa29   :  { %v756_v2 = vpop.f32.mrf.mxu2 }
 0xa2a   :  { %v757_v4 = vadd.f32 %v2072_v56, %v756_v2 }
 0xa2c   :  { %779 = vrot.lane.b32.xlu0 %v757_v4, %s1856_s21  ;;  %v1596_v6 = vmul.f32 -1.442695, %v757_v4 }
 0xa2e   :  { %1680 = vpow2.f32 %v1596_v6 }
 0xa34   :  { %v1681_v8 = vpop.eup %1680 }
 0xa35   :  { %v762_v12 = vadd.f32 1.0, %v1681_v8 }
 0xa37   :  { %1682 = vrcp.f32 %v762_v12  ;;  %v774_v60 = vand.u32 2147483648, %v762_v12  ;;  %vm768_vm7 = vweird.f32 %v762_v12  ;;  %v772_v22 = vand.u32 2147483647, %v762_v12 }
 0xa39   :  { %v775_v24 = vor.u32 1.1754944e-38, %v774_v60  ;;  %vm773_vm9 = vcmp.eq.f32.partialorder %v772_v22, 8.507059e+37 }
 0xa3d   :  { %v1683_v17 = vpop.eup %1682 }
 0xa3e   :  { %v764_v54 = vmul.f32 %v1683_v17, %v762_v12  ;;  %vm769_vm6 = vweird.f32 %v1683_v17 }
 0xa3f   :  { %vm770_vm8 = vmor %vm768_vm7, %vm769_vm6 }
 0xa40   :  { %v765_v19 = vsub.f32 1.0, %v764_v54 }
 0xa42   :  { %v766_v20 = vmul.f32 %v1683_v17, %v765_v19 }
 0xa44   :  { %v767_v15 = vadd.f32 %v1683_v17, %v766_v20 }
 0xa46   :  { %v771_v23 = vsel %vm770_vm8, %v1683_v17, %v767_v15 }
 0xa47   :  { %v776_v25 = vsel %vm773_vm9, %v775_v24, %v771_v23 }
 0xa48   :  { %v789_v21 = vsub.f32 1.0, %v776_v25  ;;  %v795_v44 = vmul.f32 %v776_v25, %v2236_v39 }
 0xa7f   :  { %v883_v14 = vpop.permute.xlu1 %882 }
 0xa80   :  { %v885_v16 = vadd.f32 %v883_v14, %v126_v63  ;;  %v1765_v63 = vld [vmem:[#allocation2] sm:$0xff] }
 0xa82   :  { %1684 = vtanh.f32 %v885_v16 }
 0xa88   :  { %v1685_v18 = vpop.eup %1684 }
 0xa89   :  { %889 = vrot.lane.b32.xlu2 %v1685_v18, %s1855_s20 }
 0xa9e   :  { %v780_v27 = vpop.permute.xlu0 %779 }
 0xa9f   :  { %v782_v28 = vmul.f32 %v780_v27, %v776_v25 }
 0xaa1   :  { %784 = vrot.lane.b32.xlu2 %v782_v28, %s1854_s17 }
 0xae3   :  { %v890_v30 = vpop.permute.xlu2 %889 }
 0xae4   :  { %v892_v11 = vmul.f32 %v890_v30, %v887_v29 }
 0xae6   :  { %v2263_v32 = vadd.f32 %v893_v31, %v892_v11 }
 0xae8   :  { %896 = vrot.lane.b32.xlu1 %v2263_v32, %s1855_s20 }
 0xafb   :  { %v785_v34 = vpop.permute.xlu2 %784 }
 0xafc   :  { %v787_v38 = vadd.f32 %v785_v34, %v757_v4 }
 0xafe   :  { %1686 = vtanh.f32 %v787_v38 }
 0xb04   :  { %v1687_v40 = vpop.eup %1686 }
 0xb05   :  { %791 = vrot.lane.b32.xlu0 %v1687_v40, %s1855_s20 }
 0xb5a   :  { %v897_v61 = vpop.permute.xlu1 %896 }
 0xb5b   :  { %1603 = vmatmul.msk.f32.vlgmr.msra.gmra.mxu2 %vm71_vm0, %v897_v61 }
 0xb5c   :  { %1340 = vmatpush.msra.mxu2 %v1762_v26 }
 0xb5e   :  { %1341 = vmatpush.msra.mxu2 %v1763_v62 }
 0xb60   :  { %1342 = vmatpush.msra.mxu2 %v1764_v52  ;;  %v61_v52 = vld [vmem:[%s2478_s0 + $0x30] sm:$0xff] }
 0xb61   :  { %1575 = vmatmul.msk.f32.gmra.mxu0 %vm71_vm0, %v61_v52 }
 0xb62   :  { %1343 = vmatpush.msra.mxu2 %v1765_v63 }
 0xb77   :  { %v792_v42 = vpop.permute.xlu0 %791 }
 0xb78   :  { %v794_v45 = vmul.f32 %v792_v42, %v789_v21 }
 0xb7a   :  { %v2274_v51 = vadd.f32 %v795_v44, %v794_v45 }
 0xb7c   :  { %798 = vrot.lane.b32.xlu1 %v2274_v51, %s1855_s20  ;;  %v899_v39 = vsel %vm71_vm0, %v897_v61, %v2274_v51 }
 0xbde   :  { %v1017_v53 = vpop.f32.mrf.mxu2 }
 0xbdf   :  { %v1018_v55 = vadd.f32 %v1968_v10, %v1017_v53  ;;  %v128_v10 = vpop.f32.mrf.mxu0 }
 0xbe1   :  { %1041 = vrot.lane.b32.xlu2 %v1018_v55, %s1854_s17 }
 0xbee   :  { %v799_v57 = vpop.permute.xlu1 %798 }
 0xbef   :  { %1597 = vmatmul.msk.f32.vlgmr.msrb.gmra.mxu3 %vm71_vm0, %v799_v57  ;;  %v131_v57 = vpop.f32.mrf.mxu0 }
 0xbf0   :  { %1239 = vmatpush.msrb.mxu3 %v1984_v35  ;;  %v2295_v35 = vld [vmem:[%s2481_s3] ss:$0 sm:$0xff]  ;;  %s1551_s3 = sshll.u32 %s2489_s11, 4  ;;  %s1862_s11 = smov [#allocation5]   ;;  %s1552_s3 = int_to_ptr.hbm [resolvable:$true] %s1551_s3 }
 0xbf2   :  { %1240 = vmatpush.msrb.mxu3 %v1989_v36  ;;  %v129_v36 = vadd.f32 %v2295_v35, %v128_v10  ;;  %v2329_v10 = vld [vmem:[%s2483_s5] ss:$0 sm:$0xff] }
 0xbf4   :  { %1241 = vmatpush.msrb.mxu3 %v1996_v37  ;;  %v1020_v37 = vadd.f32 %v1018_v55, %v129_v36 }
 0xbf6   :  { %1242 = vmatpush.msrb.mxu3 %v2016_v46  ;;  %v1604_v46 = vmul.f32 -1.442695, %v1020_v37 }
 0xbf7   :  { %1600 = vmatmul.msk.f32.vlgmr.msra.gmra.mxu3 %vm239_vm5, %v899_v39 }
 0xbf8   :  { %1243 = vmatpush.msrb.mxu3 %v2023_v47  ;;  %1688 = vpow2.f32 %v1604_v46 }
 0xbfa   :  { %1244 = vmatpush.msrb.mxu3 %v2028_v48 }
 0xbfc   :  { %1245 = vmatpush.msrb.mxu3 %v2035_v49 }
 0xbfe   :  { %1246 = vmatpush.msrb.mxu3 %v2044_v50  ;;  %v1689_v1 = vpop.eup %1688 }
 0xbff   :  { %v1024_v3 = vadd.f32 1.0, %v1689_v1  ;;  %v132_v1 = vadd.f32 %v2295_v35, %v131_v57 }
 0xc01   :  { %1690 = vrcp.f32 %v1024_v3  ;;  %v1036_v50 = vand.u32 2147483648, %v1024_v3  ;;  %vm1030_vm11 = vweird.f32 %v1024_v3  ;;  %v1034_v58 = vand.u32 2147483647, %v1024_v3 }
 0xc03   :  { %v1037_v59 = vor.u32 1.1754944e-38, %v1036_v50  ;;  %vm1035_vm13 = vcmp.eq.f32.partialorder %v1034_v58, 8.507059e+37 }
 0xc07   :  { %v1691_v47 = vpop.eup %1690 }
 0xc08   :  { %v1026_v48 = vmul.f32 %v1691_v47, %v1024_v3  ;;  %vm1031_vm10 = vweird.f32 %v1691_v47 }
 0xc09   :  { %vm1032_vm12 = vmor %vm1030_vm11, %vm1031_vm10 }
 0xc0a   :  { %v1027_v5 = vsub.f32 1.0, %v1026_v48 }
 0xc0c   :  { %v1028_v49 = vmul.f32 %v1691_v47, %v1027_v5 }
 0xc0e   :  { %v1029_v7 = vadd.f32 %v1691_v47, %v1028_v49 }
 0xc10   :  { %v1033_v13 = vsel %vm1032_vm12, %v1691_v47, %v1029_v7 }
 0xc11   :  { %v1038_v43 = vsel %vm1035_vm13, %v1037_v59, %v1033_v13 }
 0xc12   :  { %v1051_v11 = vsub.f32 1.0, %v1038_v43  ;;  %v1057_v38 = vmul.f32 %v1038_v43, %v2263_v32  ;;  %v62_v32 = vld [vmem:[%s2478_s0 + $0x38] sm:$0xff] }
 0xc13   :  { %1576 = vmatmul.msk.f32.gmra.mxu0 %vm71_vm0, %v62_v32 }
 0xc3b   :  { %v1042_v2 = vpop.permute.xlu2 %1041 }
 0xc3c   :  { %v1044_v4 = vmul.f32 %v1042_v2, %v1038_v43 }
 0xc3e   :  { %1046 = vrot.lane.b32.xlu0 %v1044_v4, %s1854_s17 }
 0xc72   :  { %v2299_v6 = vpop.f32.mrf.mxu3 }
 0xc7a   :  { %v920_v8 = vpop.f32.mrf.mxu3 }
 0xc7b   :  { %v921_v12 = vadd.f32 %v2072_v56, %v920_v8 }
 0xc7d   :  { %943 = vrot.lane.b32.xlu2 %v921_v12, %s1856_s21  ;;  %v1601_v14 = vmul.f32 -1.442695, %v921_v12 }
 0xc7f   :  { %1692 = vpow2.f32 %v1601_v14 }
 0xc85   :  { %v1693_v18 = vpop.eup %1692 }
 0xc86   :  { %v926_v54 = vadd.f32 1.0, %v1693_v18 }
 0xc88   :  { %v938_v24 = vand.u32 2147483648, %v926_v54  ;;  %vm932_vm15 = vweird.f32 %v926_v54  ;;  %v936_v25 = vand.u32 2147483647, %v926_v54 }
 0xc8a   :  { %v939_v28 = vor.u32 1.1754944e-38, %v938_v24  ;;  %vm937_vm2 = vcmp.eq.f32.partialorder %v936_v25, 8.507059e+37 }
 0xc90   :  { %v2332_v37 = vpop.f32.mrf.mxu0 }
 0xcb0   :  { %v1047_v16 = vpop.permute.xlu0 %1046 }
 0xcb1   :  { %v1049_v17 = vadd.f32 %v1047_v16, %v129_v36 }
 0xcb3   :  { %1694 = vtanh.f32 %v1049_v17 }
 0xcb4   :  { %1696 = vrcp.f32 %v926_v54 }
 0xcb9   :  { %v1695_v19 = vpop.eup %1694 }
 0xcba   :  { %1053 = vrot.lane.b32.xlu1 %v1695_v19, %s1855_s20  ;;  %v1697_v20 = vpop.eup %1696 }
 0xcbb   :  { %v928_v15 = vmul.f32 %v1697_v20, %v926_v54  ;;  %vm933_vm14 = vweird.f32 %v1697_v20 }
 0xcbc   :  { %vm934_vm1 = vmor %vm932_vm15, %vm933_vm14 }
 0xcbd   :  { %v929_v60 = vsub.f32 1.0, %v928_v15 }
 0xcbf   :  { %v930_v22 = vmul.f32 %v1697_v20, %v929_v60 }
 0xcc1   :  { %v931_v23 = vadd.f32 %v1697_v20, %v930_v22 }
 0xcc3   :  { %v935_v27 = vsel %vm934_vm1, %v1697_v20, %v931_v23 }
 0xcc4   :  { %v940_v29 = vsel %vm937_vm2, %v939_v28, %v935_v27 }
 0xcc5   :  { %v953_v21 = vsub.f32 1.0, %v940_v29  ;;  %v959_v44 = vmul.f32 %v940_v29, %v2274_v51 }
 0xcd7   :  { %v944_v30 = vpop.permute.xlu2 %943 }
 0xcd8   :  { %v946_v31 = vmul.f32 %v944_v30, %v940_v29 }
 0xcda   :  { %948 = vrot.lane.b32.xlu1 %v946_v31, %s1854_s17 }
 0xd2c   :  { %v1054_v34 = vpop.permute.xlu1 %1053 }
 0xd2d   :  { %v1056_v40 = vmul.f32 %v1054_v34, %v1051_v11 }
 0xd2f   :  { %v2306_v41 = vadd.f32 %v1057_v38, %v1056_v40 }
 0xd31   :  { %1060 = vrot.lane.b32.xlu0 %v2306_v41, %s1855_s20 }
 0xd4c   :  { %v949_v61 = vpop.permute.xlu1 %948 }
 0xd4d   :  { %v951_v26 = vadd.f32 %v949_v61, %v921_v12 }
 0xd4f   :  { %1698 = vtanh.f32 %v951_v26 }
 0xd55   :  { %v1699_v62 = vpop.eup %1698 }
 0xd56   :  { %955 = vrot.lane.b32.xlu2 %v1699_v62, %s1855_s20 }
 0xda3   :  { %v1061_v63 = vpop.permute.xlu0 %1060 }
 0xda4   :  { %1608 = vmatmul.msk.f32.vlgmr.msrb.gmra.mxu2 %vm71_vm0, %v1061_v63 }
 0xdb0   :  { %v956_v42 = vpop.permute.xlu2 %955 }
 0xdb1   :  { %v958_v45 = vmul.f32 %v956_v42, %v953_v21 }
 0xdb3   :  { %v2321_v53 = vadd.f32 %v959_v44, %v958_v45 }
 0xdb5   :  { %v1063_v55 = vsel %vm71_vm0, %v1061_v63, %v2321_v53 }
 0xdb6   :  { %1605 = vmatmul.msk.f32.vlgmr.msrb.gmra.mxu0 %vm239_vm5, %v1063_v55 }
 0xe27   :  { %v1181_v39 = vpop.f32.mrf.mxu2 }
 0xe28   :  { %v1182_v36 = vadd.f32 %v2329_v10, %v1181_v39 }
 0xe2a   :  { %1205 = vrot.lane.b32.xlu0 %v1182_v36, %s1854_s17  ;;  %v1184_v3 = vadd.f32 %v1182_v36, %v132_v1  ;;  %v2358_v36 = vld [vmem:[%s2485_s7] ss:$0 sm:$0xff] }
 0xe2c   :  { %v1609_v47 = vmul.f32 -1.442695, %v1184_v3 }
 0xe2e   :  { %1700 = vpow2.f32 %v1609_v47  ;;  %v135_v47 = vadd.f32 %v2295_v35, %v2332_v37 }
 0xe33   :  { %v1084_v51 = vpop.f32.mrf.mxu0 }
 0xe34   :  { %v1085_v46 = vadd.f32 %v2072_v56, %v1084_v51  ;;  %v1701_v5 = vpop.eup %1700 }
 0xe35   :  { %v1188_v49 = vadd.f32 1.0, %v1701_v5 }
 0xe36   :  { %1107 = vrot.lane.b32.xlu2 %v1085_v46, %s1856_s21  ;;  %v1606_v48 = vmul.f32 -1.442695, %v1085_v46 }
 0xe37   :  { %v1200_v12 = vand.u32 2147483648, %v1188_v49  ;;  %vm1194_vm4 = vweird.f32 %v1188_v49  ;;  %v1198_v14 = vand.u32 2147483647, %v1188_v49 }
 0xe38   :  { %1702 = vpow2.f32 %v1606_v48 }
 0xe39   :  { %1704 = vrcp.f32 %v1188_v49  ;;  %v1201_v18 = vor.u32 1.1754944e-38, %v1200_v12  ;;  %vm1199_vm7 = vcmp.eq.f32.partialorder %v1198_v14, 8.507059e+37 }
 0xe3e   :  { %v1703_v7 = vpop.eup %1702 }
 0xe3f   :  { %v1090_v50 = vadd.f32 1.0, %v1703_v7  ;;  %v1705_v58 = vpop.eup %1704 }
 0xe40   :  { %v1190_v13 = vmul.f32 %v1705_v58, %v1188_v49  ;;  %vm1195_vm3 = vweird.f32 %v1705_v58 }
 0xe41   :  { %1706 = vrcp.f32 %v1090_v50  ;;  %vm1196_vm6 = vmor %vm1194_vm4, %vm1195_vm3  ;;  %v1102_v60 = vand.u32 2147483648, %v1090_v50  ;;  %vm1096_vm9 = vweird.f32 %v1090_v50  ;;  %v1100_v22 = vand.u32 2147483647, %v1090_v50 }
 0xe42   :  { %v1191_v59 = vsub.f32 1.0, %v1190_v13 }
 0xe43   :  { %v1103_v25 = vor.u32 1.1754944e-38, %v1102_v60  ;;  %vm1101_vm11 = vcmp.eq.f32.partialorder %v1100_v22, 8.507059e+37 }
 0xe44   :  { %v1192_v2 = vmul.f32 %v1705_v58, %v1191_v59 }
 0xe46   :  { %v1193_v8 = vadd.f32 %v1705_v58, %v1192_v2 }
 0xe47   :  { %v1707_v43 = vpop.eup %1706 }
 0xe48   :  { %v1092_v56 = vmul.f32 %v1707_v43, %v1090_v50  ;;  %v1197_v17 = vsel %vm1196_vm6, %v1705_v58, %v1193_v8  ;;  %vm1097_vm8 = vweird.f32 %v1707_v43 }
 0xe49   :  { %v1202_v19 = vsel %vm1199_vm7, %v1201_v18, %v1197_v17  ;;  %vm1098_vm10 = vmor %vm1096_vm9, %vm1097_vm8 }
 0xe4a   :  { %v1093_v4 = vsub.f32 1.0, %v1092_v56  ;;  %v1215_v40 = vsub.f32 1.0, %v1202_v19  ;;  %v1221_v26 = vmul.f32 %v1202_v19, %v2306_v41 }
 0xe4c   :  { %v1094_v16 = vmul.f32 %v1707_v43, %v1093_v4 }
 0xe4e   :  { %v1095_v20 = vadd.f32 %v1707_v43, %v1094_v16 }
 0xe50   :  { %v1099_v23 = vsel %vm1098_vm10, %v1707_v43, %v1095_v20  ;;  %vm329_vm10 = vcmask 130048  }
 0xe51   :  { %v1104_v27 = vsel %vm1101_vm11, %v1103_v25, %v1099_v23  ;;  %vm1520_vm11 = vcmask 392192  }
 0xe52   :  { %v1117_v63 = vsub.f32 1.0, %v1104_v27  ;;  %v1123_v42 = vmul.f32 %v1104_v27, %v2321_v53 }
 0xe90   :  { %v1108_v24 = vpop.permute.xlu2 %1107 }
 0xe91   :  { %v1110_v28 = vmul.f32 %v1108_v24, %v1104_v27 }
 0xe9c   :  { %v1206_v54 = vpop.permute.xlu0 %1205 }
 0xe9d   :  { %v1208_v15 = vmul.f32 %v1206_v54, %v1202_v19 }
 0xe9f   :  { %1210 = vrot.lane.b32.xlu1 %v1208_v15, %s1854_s17 }
 0xea7   :  { %1112 = vrot.lane.b32.xlu1 %v1110_v28, %s1854_s17 }
 0xf11   :  { %v1211_v29 = vpop.permute.xlu1 %1210 }
 0xf12   :  { %v1213_v30 = vadd.f32 %v1211_v29, %v132_v1 }
 0xf14   :  { %1708 = vtanh.f32 %v1213_v30 }
 0xf19   :  { %v1113_v31 = vpop.permute.xlu1 %1112 }
 0xf1a   :  { %v1709_v11 = vpop.eup %1708  ;;  %v1115_v34 = vadd.f32 %v1113_v31, %v1085_v46 }
 0xf1b   :  { %1217 = vrot.lane.b32.xlu0 %v1709_v11, %s1855_s20 }
 0xf1c   :  { %1710 = vtanh.f32 %v1115_v34 }
 0xf22   :  { %v1711_v38 = vpop.eup %1710 }
 0xf23   :  { %1119 = vrot.lane.b32.xlu0 %v1711_v38, %s1855_s20 }
 0xf8d   :  { %v1218_v61 = vpop.permute.xlu0 %1217 }
 0xf8e   :  { %v1220_v62 = vmul.f32 %v1218_v61, %v1215_v40 }
 0xf90   :  { %v2343_v52 = vadd.f32 %v1221_v26, %v1220_v62 }
 0xf92   :  { %1224 = vrot.lane.b32.xlu2 %v2343_v52, %s1855_s20 }
 0xf95   :  { %v1120_v32 = vpop.permute.xlu0 %1119 }
 0xf96   :  { %v1122_v21 = vmul.f32 %v1120_v32, %v1117_v63 }
 0xf98   :  { %v2348_v44 = vadd.f32 %v1123_v42, %v1122_v21 }
 0xfec   :  { %v1225_v45 = vpop.permute.xlu2 %1224 }
 0xfed   :  { %v1227_v55 = vsel %vm71_vm0, %v1225_v45, %v2348_v44  ;;  %1613 = vmatmul.msk.f32.vlgmr.msra.gmra.mxu2 %vm71_vm0, %v1225_v45 }
 0xfee   :  { %1610 = vmatmul.msk.f32.vlgmr.msrb.gmra.mxu3 %vm239_vm5, %v1227_v55 }
0x1070   :  { %v1345_v41 = vpop.f32.mrf.mxu2 }
0x1071   :  { %v1346_v57 = vadd.f32 %v2329_v10, %v1345_v41  ;;  %v1248_v39 = vpop.f32.mrf.mxu3 }
0x1072   :  { %v1249_v51 = vadd.f32 %v2358_v36, %v1248_v39 }
0x1073   :  { %1369 = vrot.lane.b32.xlu1 %v1346_v57, %s1854_s17  ;;  %v1348_v10 = vadd.f32 %v1346_v57, %v135_v47 }
0x1074   :  { %1271 = vrot.lane.b32.xlu2 %v1249_v51, %s1856_s21  ;;  %v1611_v46 = vmul.f32 -1.442695, %v1249_v51 }
0x1075   :  { %v1614_v5 = vmul.f32 -1.442695, %v1348_v10 }
0x1076   :  { %1712 = vpow2.f32 %v1611_v46 }
0x107c   :  { %v1713_v1 = vpop.eup %1712 }
0x107d   :  { %v1254_v3 = vadd.f32 1.0, %v1713_v1 }
0x107f   :  { %1714 = vrcp.f32 %v1254_v3  ;;  %v1266_v43 = vand.u32 2147483648, %v1254_v3  ;;  %vm1260_vm13 = vweird.f32 %v1254_v3  ;;  %v1264_v56 = vand.u32 2147483647, %v1254_v3 }
0x1080   :  { %1716 = vpow2.f32 %v1614_v5 }
0x1081   :  { %v1267_v4 = vor.u32 1.1754944e-38, %v1266_v43  ;;  %vm1265_vm15 = vcmp.eq.f32.partialorder %v1264_v56, 8.507059e+37  ;;  %v2401_v43 = vld [vmem:[%s2487_s9] ss:$0 sm:$0xff]  ;;  %s1858_s9 = smov 16  }
0x1085   :  { %v1715_v48 = vpop.eup %1714 }
0x1086   :  { %v1256_v49 = vmul.f32 %v1715_v48, %v1254_v3  ;;  %v1717_v50 = vpop.eup %1716  ;;  %vm1261_vm12 = vweird.f32 %v1715_v48 }
0x1087   :  { %v1352_v13 = vadd.f32 1.0, %v1717_v50  ;;  %vm1262_vm14 = vmor %vm1260_vm13, %vm1261_vm12  ;;  %v1769_v50 = vld [vmem:[%s2486_s8 + $0x18] sm:$0xff]  ;;  %vm1523_vm12 = vcmask 654336   ;;  %vm1525_vm13 = vcmask 785408  }
0x1088   :  { %v1257_v7 = vsub.f32 1.0, %v1256_v49 }
0x1089   :  { %1718 = vrcp.f32 %v1352_v13  ;;  %v1364_v54 = vand.u32 2147483648, %v1352_v13  ;;  %vm1358_vm2 = vweird.f32 %v1352_v13  ;;  %v1362_v19 = vand.u32 2147483647, %v1352_v13 }
0x108a   :  { %v1258_v58 = vmul.f32 %v1715_v48, %v1257_v7 }
0x108b   :  { %v1365_v15 = vor.u32 1.1754944e-38, %v1364_v54  ;;  %vm1363_vm4 = vcmp.eq.f32.partialorder %v1362_v19, 8.507059e+37 }
0x108c   :  { %v1259_v59 = vadd.f32 %v1715_v48, %v1258_v58  ;;  %v1770_v58 = vld [vmem:[%s2486_s8 + $0x10] sm:$0xff] }
0x108e   :  { %v1263_v2 = vsel %vm1262_vm14, %v1715_v48, %v1259_v59  ;;  %v1772_v59 = vld [vmem:[%s2486_s8] sm:$0xff]  ;;  %vm1527_vm14 = vcmask 916480  }
0x108f   :  { %v1268_v37 = vsel %vm1265_vm15, %v1267_v4, %v1263_v2  ;;  %v1719_v8 = vpop.eup %1718  ;;  %v656_v2 = vadd.f32 %v2401_v43, %v2256_v0 }
0x1090   :  { %v1354_v14 = vmul.f32 %v1719_v8, %v1352_v13  ;;  %vm1359_vm1 = vweird.f32 %v1719_v8  ;;  %v1281_v26 = vsub.f32 1.0, %v1268_v37  ;;  %v1287_v32 = vmul.f32 %v1268_v37, %v2348_v44  ;;  %v1771_v13 = vld [vmem:[%s2486_s8 + $0x8] sm:$0xff]  ;;  %s1857_s8 = smov 48  }
0x1091   :  { %vm1360_vm3 = vmor %vm1358_vm2, %vm1359_vm1  ;;  %v658_v4 = vsel %vm329_vm10, %v656_v2, -inf }
0x1092   :  { %v1355_v16 = vsub.f32 1.0, %v1354_v14 }
0x1094   :  { %v1356_v17 = vmul.f32 %v1719_v8, %v1355_v16 }
0x1096   :  { %v1357_v18 = vadd.f32 %v1719_v8, %v1356_v17 }
0x1098   :  { %v1361_v20 = vsel %vm1360_vm3, %v1719_v8, %v1357_v18 }
0x1099   :  { %v1366_v60 = vsel %vm1363_vm4, %v1365_v15, %v1361_v20 }
0x109a   :  { %v1379_v31 = vsub.f32 1.0, %v1366_v60  ;;  %v1385_v34 = vmul.f32 %v1366_v60, %v2343_v52 }
0x10ce   :  { %v1272_v35 = vpop.permute.xlu2 %1271 }
0x10cf   :  { %v1274_v12 = vmul.f32 %v1272_v35, %v1268_v37 }
0x10d1   :  { %1276 = vrot.lane.b32.xlu1 %v1274_v12, %s1854_s17 }
0x10e5   :  { %v1370_v22 = vpop.permute.xlu1 %1369 }
0x10e6   :  { %v1372_v23 = vmul.f32 %v1370_v22, %v1366_v60 }
0x10e8   :  { %1374 = vrot.lane.b32.xlu0 %v1372_v23, %s1854_s17 }
0x1143   :  { %v1277_v24 = vpop.permute.xlu1 %1276 }
0x1144   :  { %v1279_v25 = vadd.f32 %v1277_v24, %v1249_v51 }
0x1146   :  { %1720 = vtanh.f32 %v1279_v25 }
0x114c   :  { %v1721_v27 = vpop.eup %1720 }
0x114d   :  { %1283 = vrot.lane.b32.xlu0 %v1721_v27, %s1855_s20 }
0x115a   :  { %v1375_v28 = vpop.permute.xlu0 %1374 }
0x115b   :  { %v1377_v29 = vadd.f32 %v1375_v28, %v135_v47 }
0x115d   :  { %1722 = vtanh.f32 %v1377_v29 }
0x1163   :  { %v1723_v30 = vpop.eup %1722 }
0x1164   :  { %1381 = vrot.lane.b32.xlu2 %v1723_v30, %s1855_s20 }
0x11be   :  { %v1382_v11 = vpop.permute.xlu2 %1381 }
0x11bf   :  { %v1384_v38 = vmul.f32 %v1382_v11, %v1379_v31  ;;  %v1284_v61 = vpop.permute.xlu0 %1283  ;;  %v492_v31 = vadd.f32 %v2401_v43, %v2213_v33 }
0x11c0   :  { %v1286_v62 = vmul.f32 %v1284_v61, %v1281_v26 }
0x11c1   :  { %v1386_v40 = vadd.f32 %v1385_v34, %v1384_v38  ;;  %v494_v11 = vsel %vm329_vm10, %v492_v31, -inf }
0x11c2   :  { %v2372_v63 = vadd.f32 %v1287_v32, %v1286_v62 }
0x11c3   :  { %1388 = vrot.lane.b32.xlu1 %v1386_v40, %s1855_s20 }
0x1235   :  { %v1389_v21 = vpop.permute.xlu1 %1388 }
0x1236   :  { %v1391_v42 = vsel %vm71_vm0, %v1389_v21, %v2372_v63  ;;  %1530 = vst.msk [vmem:[#allocation6] sm:$0xff] %vm71_vm0, %v1389_v21 }
0x1237   :  { %1615 = vmatmul.msk.f32.vlgmr.msra.gmra.mxu0 %vm239_vm5, %v1391_v42 }
0x12b4   :  { %v1412_v52 = vpop.f32.mrf.mxu0 }
0x12b5   :  { %v1413_v45 = vadd.f32 %v2358_v36, %v1412_v52 }
0x12b7   :  { %1435 = vrot.lane.b32.xlu2 %v1413_v45, %s1856_s21  ;;  %v1616_v55 = vmul.f32 -1.442695, %v1413_v45 }
0x12b9   :  { %1724 = vpow2.f32 %v1616_v55 }
0x12bf   :  { %962 = vrot.lane.b32.xlu2 %v2321_v53, %s1855_s20  ;;  %v1725_v41 = vpop.eup %1724 }
0x12c0   :  { %v1418_v57 = vadd.f32 1.0, %v1725_v41 }
0x12c2   :  { %1726 = vrcp.f32 %v1418_v57  ;;  %v1430_v47 = vand.u32 2147483648, %v1418_v57  ;;  %vm1424_vm7 = vweird.f32 %v1418_v57  ;;  %v1428_v10 = vand.u32 2147483647, %v1418_v57 }
0x12c4   :  { %v1431_v48 = vor.u32 1.1754944e-38, %v1430_v47  ;;  %vm1429_vm9 = vcmp.eq.f32.partialorder %v1428_v10, 8.507059e+37 }
0x12c8   :  { %v1727_v39 = vpop.eup %1726 }
0x12c9   :  { %v1420_v51 = vmul.f32 %v1727_v39, %v1418_v57  ;;  %vm1425_vm6 = vweird.f32 %v1727_v39  ;;  %v820_v57 = vadd.f32 %v2401_v43, %v2299_v6 }
0x12ca   :  { %vm1426_vm8 = vmor %vm1424_vm7, %vm1425_vm6 }
0x12cb   :  { %v1421_v46 = vsub.f32 1.0, %v1420_v51 }
0x12cd   :  { %v1422_v1 = vmul.f32 %v1727_v39, %v1421_v46 }
0x12cf   :  { %v1423_v3 = vadd.f32 %v1727_v39, %v1422_v1 }
0x12d1   :  { %v1427_v36 = vsel %vm1426_vm8, %v1727_v39, %v1423_v3  ;;  %v822_v39 = vsel %vm329_vm10, %v820_v57, -inf }
0x12d2   :  { %v1432_v53 = vsel %vm1429_vm9, %v1431_v48, %v1427_v36 }
0x12d3   :  { %v1445_v24 = vsub.f32 1.0, %v1432_v53  ;;  %v1451_v27 = vmul.f32 %v1432_v53, %v2372_v63 }
0x1311   :  { %v1436_v5 = vpop.permute.xlu2 %1435 }
0x1312   :  { %v1438_v49 = vmul.f32 %v1436_v5, %v1432_v53 }
0x1314   :  { %1440 = vrot.lane.b32.xlu0 %v1438_v49, %s1854_s17 }
0x1319   :  { %v963_v7 = vpop.permute.xlu2 %962 }
0x131a   :  { %1602 = vmatmul.msk.f32.vlgmr.msrb.gmra.mxu1 %vm71_vm0, %v963_v7 }
0x131b   :  { %1306 = vmatpush.msrb.mxu1 %v1769_v50 }
0x131c   :  { %1126 = vrot.lane.b32.xlu0 %v2348_v44, %s1855_s20  ;;  %v327_v44 = vadd.f32 %v2401_v43, %v2166_v9 }
0x131d   :  { %1307 = vmatpush.msrb.mxu1 %v1770_v58 }
0x131e   :  { %v330_v56 = vsel %vm329_vm10, %v327_v44, -inf }
0x131f   :  { %1308 = vmatpush.msrb.mxu1 %v1771_v13 }
0x1321   :  { %1309 = vmatpush.msrb.mxu1 %v1772_v59 }
0x1346   :  { %331 = vmax.xlane.f32.xlu0 %v330_v56 }
0x134e   :  { %659 = vmax.xlane.f32.xlu0 %v658_v4 }
0x1386   :  { %v1441_v35 = vpop.permute.xlu0 %1440 }
0x1387   :  { %v1443_v37 = vadd.f32 %v1441_v35, %v1413_v45 }
0x1389   :  { %1728 = vtanh.f32 %v1443_v37 }
0x138e   :  { %v1127_v8 = vpop.permute.xlu0 %1126 }
0x138f   :  { %v1729_v12 = vpop.eup %1728  ;;  %1607 = vmatmul.msk.f32.vlgmr.msra.gmra.mxu1 %vm71_vm0, %v1127_v8 }
0x1390   :  { %1447 = vrot.lane.b32.xlu1 %v1729_v12, %s1855_s20  ;;  %1470 = vmatpush.msra.mxu1 %v1769_v50 }
0x1392   :  { %1471 = vmatpush.msra.mxu1 %v1770_v58 }
0x1394   :  { %1472 = vmatpush.msra.mxu1 %v1771_v13 }
0x1396   :  { %1473 = vmatpush.msra.mxu1 %v1772_v59 }
0x1397   :  { %v983_v60 = vpop.f32.mrf.mxu1 }
0x1398   :  { %1290 = vrot.lane.b32.xlu1 %v2372_v63, %s1855_s20  ;;  %v984_v22 = vadd.f32 %v2401_v43, %v983_v60 }
0x139a   :  { %v986_v23 = vsel %vm329_vm10, %v984_v22, -inf }
0x13b9   :  { %v332_v9 = vpop.xlane.xlu0 %331 }
0x13ba   :  { %v2413_v0 = vsub.f32 %v327_v44, %v332_v9 }
0x13bc   :  { %v334_v14 = vmul.f32 1.442695, %v2413_v0 }
0x13be   :  { %1730 = vpow2.f32 %v334_v14 }
0x13c1   :  { %v660_v16 = vpop.xlane.xlu0 %659 }
0x13c2   :  { %v2416_v17 = vsub.f32 %v656_v2, %v660_v16 }
0x13c4   :  { %v1731_v18 = vpop.eup %1730  ;;  %v662_v54 = vmul.f32 1.442695, %v2416_v17 }
0x13c5   :  { %v336_v19 = vsel %vm329_vm10, %v1731_v18, 0.0 }
0x13c6   :  { %1732 = vpow2.f32 %v662_v54  ;;  %337 = vadd.xlane.f32.xlu1 %v336_v19 }
0x13cc   :  { %v1733_v20 = vpop.eup %1732 }
0x13cd   :  { %v664_v15 = vsel %vm329_vm10, %v1733_v20, 0.0 }
0x13ce   :  { %665 = vadd.xlane.f32.xlu1 %v664_v15 }
0x13d6   :  { %987 = vmax.xlane.f32.xlu1 %v986_v23 }
0x1402   :  { %v1448_v25 = vpop.permute.xlu1 %1447 }
0x1403   :  { %v1450_v28 = vmul.f32 %v1448_v25, %v1445_v24 }
0x1405   :  { %v1452_v29 = vadd.f32 %v1451_v27, %v1450_v28 }
0x1407   :  { %1454 = vrot.lane.b32.xlu2 %v1452_v29, %s1855_s20 }
0x140a   :  { %v1291_v30 = vpop.permute.xlu1 %1290 }
0x140b   :  { %1612 = vmatmul.msk.f32.vlgmr.msrb.gmra.mxu1 %vm71_vm0, %v1291_v30 }
0x140c   :  { %v1147_v38 = vpop.f32.mrf.mxu1 }
0x140d   :  { %v1148_v2 = vadd.f32 %v2401_v43, %v1147_v38 }
0x140f   :  { %v1150_v4 = vsel %vm329_vm10, %v1148_v2, -inf }
0x1430   :  { %495 = vmax.xlane.f32.xlu2 %v494_v11 }
0x1439   :  { %v2433_v62 = vpop.xlane.xlu1 %337 }
0x1441   :  { %v666_v32 = vpop.xlane.xlu1 %665 }
0x1449   :  { %v988_v42 = vpop.xlane.xlu1 %987 }
0x144a   :  { %v2438_v45 = vsub.f32 %v984_v22, %v988_v42 }
0x144c   :  { %v990_v41 = vmul.f32 1.442695, %v2438_v45 }
0x1461   :  { %v1455_v34 = vpop.permute.xlu2 %1454 }
0x1462   :  { %1533 = vst.msk [vmem:[#allocation6 + $0x8] sm:$0xff] %vm71_vm0, %v1455_v34  ;;  %1617 = vmatmul.msk.f32.vlgmr.msra.gmra.mxu1 %vm71_vm0, %v1455_v34 }
0x1463   :  { %1557 = dma.vmem_to_hbm [thread:$0]  %s1550_s26, 256, %s1552_s3, [#allocation7], %s1852_s22, %s1852_s22, %s1853_s23  }
0x1464   :  { %s1539_s22 = sshll.u32 %s1862_s11, 4  ;;  %s1540_s22 = int_to_ptr.vmem [resolvable:$true] %s1539_s22 }
0x1488   :  { %v1311_v40 = vpop.f32.mrf.mxu1 }
0x1489   :  { %v1312_v61 = vadd.f32 %v2401_v43, %v1311_v40 }
0x148b   :  { %v1314_v26 = vsel %vm329_vm10, %v1312_v61, -inf }
0x148c   :  { %1315 = vmax.xlane.f32.xlu1 %v1314_v26 }
0x14a3   :  { %v496_v63 = vpop.xlane.xlu2 %495 }
0x14a4   :  { %v2435_v33 = vsub.f32 %v492_v31, %v496_v63 }
0x14a6   :  { %v498_v21 = vmul.f32 1.442695, %v2435_v33 }
0x14a8   :  { %1734 = vpow2.f32 %v498_v21 }
0x14a9   :  { %1736 = vpow2.f32 %v990_v41 }
0x14ae   :  { %v1735_v52 = vpop.eup %1734 }
0x14af   :  { %v500_v55 = vsel %vm329_vm10, %v1735_v52, 0.0  ;;  %v1737_v51 = vpop.eup %1736 }
0x14b0   :  { %501 = vadd.xlane.f32.xlu2 %v500_v55  ;;  %v992_v46 = vsel %vm329_vm10, %v1737_v51, 0.0 }
0x14b8   :  { %823 = vmax.xlane.f32.xlu2 %v822_v39 }
0x14c0   :  { %993 = vadd.xlane.f32.xlu2 %v992_v46 }
0x14df   :  { %v1475_v1 = vpop.f32.mrf.mxu1 }
0x14e0   :  { %v1476_v3 = vadd.f32 %v2401_v43, %v1475_v1 }
0x14e2   :  { %v1478_v47 = vsel %vm329_vm10, %v1476_v3, -inf }
0x14e3   :  { %1479 = vmax.xlane.f32.xlu2 %v1478_v47 }
0x14ff   :  { %v1316_v10 = vpop.xlane.xlu1 %1315 }
0x1500   :  { %v2448_v36 = vsub.f32 %v1312_v61, %v1316_v10 }
0x1502   :  { %v1318_v48 = vmul.f32 1.442695, %v2448_v36 }
0x1504   :  { %1738 = vpow2.f32 %v1318_v48 }
0x1505   :  { %1740 = vlog2.f32 %v666_v32 }
0x150a   :  { %v1739_v6 = vpop.eup %1738 }
0x150b   :  { %v1320_v5 = vsel %vm329_vm10, %v1739_v6, 0.0  ;;  %v1741_v53 = vpop.eup %1740 }
0x150c   :  { %1321 = vadd.xlane.f32.xlu1 %v1320_v5  ;;  %v668_v49 = vmul.f32 0.6931472, %v1741_v53 }
0x150e   :  { %v669_v50 = vsub.f32 %v2416_v17, %v668_v49 }
0x1523   :  { %v502_v7 = vpop.xlane.xlu2 %501 }
0x1525   :  { %1495 = vrot.lane.b32.xlu1 %v669_v50, %s1856_s21  ;;  %s1859_s21 = smov 112  }
0x152b   :  { %v824_v58 = vpop.xlane.xlu2 %823 }
0x152c   :  { %v825_v13 = vsub.f32 %v820_v57, %v824_v58 }
0x152e   :  { %v826_v59 = vmul.f32 1.442695, %v825_v13 }
0x1530   :  { %1742 = vpow2.f32 %v826_v59 }
0x1533   :  { %v994_v35 = vpop.xlane.xlu2 %993 }
0x1536   :  { %v1743_v44 = vpop.eup %1742 }
0x1537   :  { %v828_v56 = vsel %vm329_vm10, %v1743_v44, 0.0 }
0x1538   :  { %829 = vadd.xlane.f32.xlu0 %v828_v56 }
0x1540   :  { %1151 = vmax.xlane.f32.xlu0 %v1150_v4 }
0x1556   :  { %v1480_v37 = vpop.xlane.xlu2 %1479 }
0x1557   :  { %v1481_v8 = vsub.f32 %v1476_v3, %v1480_v37 }
0x1559   :  { %v1482_v12 = vmul.f32 1.442695, %v1481_v8 }
0x155b   :  { %1744 = vpow2.f32 %v1482_v12 }
0x1561   :  { %v1745_v9 = vpop.eup %1744 }
0x1562   :  { %v1484_v14 = vsel %vm329_vm10, %v1745_v9, 0.0 }
0x1563   :  { %1485 = vadd.xlane.f32.xlu2 %v1484_v14 }
0x157f   :  { %v1322_v24 = vpop.xlane.xlu1 %1321 }
0x1597   :  { %v1496_v41 = vpop.permute.xlu1 %1495 }
0x15ab   :  { %v830_v16 = vpop.xlane.xlu0 %829 }
0x15ac   :  { %1746 = vlog2.f32 %v830_v16 }
0x15b2   :  { %v1747_v17 = vpop.eup %1746 }
0x15b3   :  { %v832_v18 = vmul.f32 0.6931472, %v1747_v17  ;;  %v1152_v54 = vpop.xlane.xlu0 %1151 }
0x15b4   :  { %v1153_v19 = vsub.f32 %v1148_v2, %v1152_v54 }
0x15b5   :  { %v833_v20 = vsub.f32 %v825_v13, %v832_v18 }
0x15b6   :  { %v1154_v43 = vmul.f32 1.442695, %v1153_v19 }
0x15b7   :  { %1499 = vrot.lane.b32.xlu2 %v833_v20, %s1857_s8 }
0x15b8   :  { %1748 = vpow2.f32 %v1154_v43 }
0x15b9   :  { %1750 = vlog2.f32 %v502_v7 }
0x15ba   :  { %1752 = vlog2.f32 %v994_v35 }
0x15bb   :  { %1754 = vlog2.f32 %v1322_v24 }
0x15be   :  { %v1749_v15 = vpop.eup %1748 }
0x15bf   :  { %v1156_v60 = vsel %vm329_vm10, %v1749_v15, 0.0  ;;  %v1751_v22 = vpop.eup %1750 }
0x15c0   :  { %1157 = vadd.xlane.f32.xlu0 %v1156_v60  ;;  %v504_v23 = vmul.f32 0.6931472, %v1751_v22  ;;  %v1753_v27 = vpop.eup %1752 }
0x15c1   :  { %v996_v28 = vmul.f32 0.6931472, %v1753_v27  ;;  %v1755_v31 = vpop.eup %1754 }
0x15c2   :  { %v505_v25 = vsub.f32 %v2435_v33, %v504_v23  ;;  %v1324_v34 = vmul.f32 0.6931472, %v1755_v31 }
0x15c3   :  { %v997_v30 = vsub.f32 %v2438_v45, %v996_v28 }
0x15c4   :  { %v1325_v61 = vsub.f32 %v2448_v36, %v1324_v34 }
0x15d4   :  { %1491 = vrot.lane.b32.xlu0 %v505_v25, %s1858_s9 }
0x15d6   :  { %v1486_v29 = vpop.xlane.xlu2 %1485 }
0x15d7   :  { %1756 = vlog2.f32 %v1486_v29 }
0x15dc   :  { %1503 = vrot.lane.b32.xlu0 %v997_v30, %s1854_s17  ;;  %s1861_s17 = smov 80  }
0x15dd   :  { %v1757_v11 = vpop.eup %1756 }
0x15de   :  { %v1488_v38 = vmul.f32 0.6931472, %v1757_v11 }
0x15e0   :  { %v1489_v40 = vsub.f32 %v1481_v8, %v1488_v38 }
0x15e2   :  { %1515 = vrot.lane.b32.xlu2 %v1489_v40, %s1859_s21 }
0x15e4   :  { %1511 = vrot.lane.b32.xlu0 %v1325_v61, %s1855_s20 }
0x1611   :  { %v1500_v39 = vpop.permute.xlu2 %1499 }
0x1633   :  { %v1158_v26 = vpop.xlane.xlu0 %1157 }
0x1634   :  { %1758 = vlog2.f32 %v1158_v26 }
0x1635   :  { %1760 = vlog2.f32 %v2433_v62 }
0x163a   :  { %v1759_v32 = vpop.eup %1758 }
0x163b   :  { %v1160_v63 = vmul.f32 0.6931472, %v1759_v32  ;;  %v1761_v42 = vpop.eup %1760 }
0x163c   :  { %v340_v52 = vmul.f32 0.6931472, %v1761_v42  ;;  %v1516_v47 = vpop.permute.xlu2 %1515 }
0x163d   :  { %v1161_v33 = vsub.f32 %v1153_v19, %v1160_v63 }
0x163e   :  { %v341_v45 = vsub.f32 %v2413_v0, %v340_v52 }
0x163f   :  { %1507 = vrot.lane.b32.xlu1 %v1161_v33, %s1861_s17 }
0x1646   :  { %v1492_v21 = vpop.permute.xlu0 %1491 }
0x1647   :  { %v1518_v57 = vsel %vm329_vm10, %v341_v45, %v1492_v21 }
0x1648   :  { %v1519_v51 = vsel %vm71_vm0, %v1518_v57, %v1496_v41 }
0x1649   :  { %v1521_v46 = vsel %vm1520_vm11, %v1519_v51, %v1500_v39 }
0x164e   :  { %v1504_v55 = vpop.permute.xlu0 %1503 }
0x164f   :  { %v1522_v62 = vsel %vm239_vm5, %v1521_v46, %v1504_v55 }
0x1656   :  { %v1512_v1 = vpop.permute.xlu0 %1511 }
0x16b1   :  { %v1508_v0 = vpop.permute.xlu1 %1507 }
0x16b2   :  { %v1524_v3 = vsel %vm1523_vm12, %v1522_v62, %v1508_v0 }
0x16b3   :  { %v1526_v10 = vsel %vm1525_vm13, %v1524_v3, %v1512_v1 }
0x16b4   :  { %v1528_v36 = vsel %vm1527_vm14, %v1526_v10, %v1516_v47 }
0x16b5   :  { %1529 = vst [vmem:[#allocation5] sm:$0xff] %v1528_v36 }
0x16b6   :  { %1544 = dma.vmem_to_hbm [thread:$0]  %s1540_s22, 128, %s1542_s27, [#allocation4]  }
0x16b7   :  { %1847 = dma.done.wait [#allocation4], 128  }
0x16b8   :  { %1848 = vsyncadd [#allocation4], 4294967168 }
0x16b9   :  { %1849 = dma.done.wait [#allocation7], 256  }
0x16ba   :  { %1850 = vsyncadd [#allocation7], 4294967040 }
0x16bb   :  { %1566 = vsyncpa [#allocation3], 1 }
0x16bc   :  { %1567 = vsyncpa [#allocation4], 1 }
0x16bd   :  { %1568 = vsyncpa [#allocation7], 1 }

</bundles_post_ra>
